<compile_context>
chip_gen: v7x
topology: tpu7x:2x2x1
jax: 0.10.0
libtpu: 0.0.40
codegen_flags: <defaults>
</compile_context>

<pallas_src>
import jax
import jax.numpy as jnp
import numpy as np
from jax.experimental import pallas as pl
from jax.experimental.pallas import tpu as pltpu

PAD = 23        # ConstantPad1d padding on each side
PAD_VAL = 0.25  # ConstantPad1d value
POOL = 124      # MaxPool1d kernel_size (== conv output length -> one window)
LANES = 128     # per-sample lane stride (POOL rounded up to the vreg width)


def _round_up(x, m):
    return (x + m - 1) // m * m


def deepbind_kernel(x_ref, w_ref, b1_ref, w2_ref, b2_ref, o_ref):
    Bt, C, L = x_ref.shape              # (batch tile, 4, 101)
    O, CK = w_ref.shape                 # (16, 96)
    K = CK // C                         # 24
    pad_r = (LANES + K - 1) - PAD - L   # right fill so every k-shift is 128 wide

    w = w_ref[...]                      # (16, 96), rows ordered k*C + c
    b1 = b1_ref[...]                    # (16, 1)
    w2 = w2_ref[...]                    # (1, 16)
    b2 = b2_ref[...]                    # (1, 1)

    fill_l = jnp.full((C, PAD), PAD_VAL, jnp.float32)
    fill_r = jnp.full((C, pad_r), PAD_VAL, jnp.float32)

    # im2col: per sample, K=24 lane-shifted copies stacked on sublanes -> (96,128);
    # the 128-lane sample blocks concatenate along lanes at vreg boundaries.
    blocks = []
    for b in range(Bt):                 # small static tile loop (layout only)
        xb = jnp.concatenate([fill_l, x_ref[b], fill_r], axis=1)        # (4, 151)
        blocks.append(
            jnp.concatenate([xb[:, k:k + LANES] for k in range(K)], axis=0))
    patches = jnp.concatenate(blocks, axis=1)                           # (96, Bt*128)

    # Conv1d as a single MXU matmul (contraction = C*K = 96), then bias + ReLU.
    h = jnp.dot(w, patches, preferred_element_type=jnp.float32)         # (16, Bt*128)
    h = jnp.maximum(h + b1, 0.0)

    # MaxPool1d(124): per-sample max over the first 124 lanes of its 128-group
    # (the 4 trailing lanes per sample are never read -> no masking needed).
    pooled = jnp.concatenate(
        [jnp.max(h[:, b * LANES:b * LANES + POOL], axis=1, keepdims=True)
         for b in range(Bt)], axis=1)                                   # (16, Bt)

    # Dropout(0) is identity; Linear(16 -> 1) + Sigmoid; one store per step.
    z = jnp.dot(w2, pooled, preferred_element_type=jnp.float32) + b2    # (1, Bt)
    o_ref[...] = (1.0 / (1.0 + jnp.exp(-z)))[None]                      # (1, 1, Bt)


def deepbind_forward(x, w1, b1, w2, b2, *, block_b=16):
    """x: (B, 4, L) float32 (PyTorch NCW); returns (B, 1) float32."""
    B, C, L = x.shape
    O, Cw, K = w1.shape
    assert (C, Cw, O, K) == (4, 4, 16, 24)
    lout = L + 2 * PAD - K + 1
    # Linear(16, 1) after Flatten requires exactly one MaxPool1d(124) window.
    assert lout == POOL, "DeepBind requires conv output length == 124 (L == 101)"

    Bt = min(block_b, _round_up(max(B, 1), 8))   # batch tile (multiple of 8)
    Bp = _round_up(B, Bt)
    T = Bp // Bt

    x = x.astype(jnp.float32)
    if Bp != B:
        x = jnp.pad(x, ((0, Bp - B), (0, 0), (0, 0)))   # pad batch with dummies

    # Fix weight layouts once in the wrapper (kernel never slices w[:, :, k]).
    w1r = jnp.transpose(w1, (0, 2, 1)).reshape(O, K * C).astype(jnp.float32)
    b1c = b1.reshape(O, 1).astype(jnp.float32)
    w2r = w2.reshape(1, O).astype(jnp.float32)
    b2c = b2.reshape(1, 1).astype(jnp.float32)

    out = pl.pallas_call(
        deepbind_kernel,
        out_shape=jax.ShapeDtypeStruct((T, 1, Bt), jnp.float32),
        grid=(T,),
        in_specs=[
            pl.BlockSpec((Bt, C, L), lambda i: (i, 0, 0)),   # batch-tiled input
            pl.BlockSpec((O, K * C), lambda i: (0, 0)),      # conv weight (16,96)
            pl.BlockSpec((O, 1), lambda i: (0, 0)),          # conv bias
            pl.BlockSpec((1, O), lambda i: (0, 0)),          # dense weight
            pl.BlockSpec((1, 1), lambda i: (0, 0)),          # dense bias
        ],
        out_specs=pl.BlockSpec((1, 1, Bt), lambda i: (i, 0, 0)),
        compiler_params=pltpu.CompilerParams(
            dimension_semantics=("parallel",),
        ),
    )(x, w1r, b1c, w2r, b2c)

    return out.reshape(Bp, 1)[:B]


def deepbind_ref(x, w1, b1, w2, b2):
    """Pure-JAX reference (no Pallas) for correctness checking."""
    x_pad = jnp.pad(x, ((0, 0), (0, 0), (PAD, PAD)), constant_values=PAD_VAL)
    K = w1.shape[2]
    Lout = x_pad.shape[2] - K + 1
    patches = jnp.stack([x_pad[:, :, k:k + Lout] for k in range(K)], axis=-1)
    conv = jnp.einsum('bclk,ock->bol', patches, w1) + b1[None, :, None]
    h = jnp.maximum(conv, 0.0)
    pooled = jnp.max(h[:, :, :POOL], axis=2)          # (B, 16)
    z = pooled @ w2.T + b2
    return 1.0 / (1.0 + jnp.exp(-z))


if __name__ == "__main__":
    key = jax.random.PRNGKey(0)
    k1, k2, k3, k4, k5 = jax.random.split(key, 5)

    # DeepBind canonical sequence length: L=101 -> conv out 124 -> one pool window.
    B, C, L = 2, 4, 101
    O, K = 16, 24

    x = jax.random.uniform(k1, (B, C, L), jnp.float32)

    # Deterministic synthetic parameters (PyTorch-default-like uniform fan-in init).
    fan1 = C * K
    lim1 = 1.0 / np.sqrt(fan1)
    w1 = jax.random.uniform(k2, (O, C, K), jnp.float32, -lim1, lim1)
    b1 = jax.random.uniform(k3, (O,), jnp.float32, -lim1, lim1)
    lim2 = 1.0 / np.sqrt(O)
    w2 = jax.random.uniform(k4, (1, O), jnp.float32, -lim2, lim2)
    b2 = jax.random.uniform(k5, (1,), jnp.float32, -lim2, lim2)

    out = jax.block_until_ready(deepbind_forward(x, w1, b1, w2, b2))
    ref = jax.block_until_ready(deepbind_ref(x, w1, b1, w2, b2))

    assert out.shape == (B, 1), out.shape
    assert np.allclose(np.asarray(out), np.asarray(ref), atol=1e-5, rtol=1e-5), (
        np.asarray(out), np.asarray(ref))
    print("KERNEL_OK")
</pallas_src>

<mosaic_0001>
module attributes {stable_mosaic.version = 11 : i64} {
  func.func @deepbind_kernel(%arg0: i32, %arg1: memref<8x4x101xf32, #tpu.memory_space<vmem>>, %arg2: memref<16x96xf32, #tpu.memory_space<vmem>>, %arg3: memref<16x1xf32, #tpu.memory_space<vmem>>, %arg4: memref<1x16xf32, #tpu.memory_space<vmem>>, %arg5: memref<1x1xf32, #tpu.memory_space<vmem>>, %arg6: memref<1x1x8xf32, #tpu.memory_space<vmem>>) attributes {dimension_semantics = [#tpu.dimension_semantics<parallel>], iteration_bounds = array<i64: 1>, scalar_prefetch = 0 : i64, scratch_operands = 0 : i64, tpu.core_type = #tpu.core_type<tc>, window_params = [{transform_indices = @transform_0, window_bounds = array<i64: 8, 4, 101>}, {pipeline_mode = #tpu.pipeline_mode<synchronous>, transform_indices = @transform_1, window_bounds = array<i64: 16, 96>}, {pipeline_mode = #tpu.pipeline_mode<synchronous>, transform_indices = @transform_2, window_bounds = array<i64: 16, 1>}, {pipeline_mode = #tpu.pipeline_mode<synchronous>, transform_indices = @transform_3, window_bounds = array<i64: 1, 16>}, {pipeline_mode = #tpu.pipeline_mode<synchronous>, transform_indices = @transform_4, window_bounds = array<i64: 1, 1>}, {transform_indices = @transform_5, window_bounds = array<i64: 1, 1, 8>}]} {
    %c0 = arith.constant 0 : index
    %c0_0 = arith.constant 0 : index
    %0 = vector.load %arg2[%c0, %c0_0] : memref<16x96xf32, #tpu.memory_space<vmem>>, vector<16x96xf32>
    %c0_1 = arith.constant 0 : index
    %c0_2 = arith.constant 0 : index
    %1 = vector.load %arg3[%c0_1, %c0_2] : memref<16x1xf32, #tpu.memory_space<vmem>>, vector<16x1xf32>
    %c0_3 = arith.constant 0 : index
    %c0_4 = arith.constant 0 : index
    %2 = vector.load %arg4[%c0_3, %c0_4] : memref<1x16xf32, #tpu.memory_space<vmem>>, vector<1x16xf32>
    %c0_5 = arith.constant 0 : index
    %c0_6 = arith.constant 0 : index
    %3 = vector.load %arg5[%c0_5, %c0_6] : memref<1x1xf32, #tpu.memory_space<vmem>>, vector<1x1xf32>
    %cst = arith.constant 2.500000e-01 : f32
    %4 = vector.broadcast %cst : f32 to vector<4x23xf32>
    %cst_7 = arith.constant 2.500000e-01 : f32
    %5 = vector.broadcast %cst_7 : f32 to vector<4x27xf32>
    %c0_8 = arith.constant 0 : index
    %c0_9 = arith.constant 0 : index
    %c0_10 = arith.constant 0 : index
    %6 = vector.load %arg1[%c0_8, %c0_9, %c0_10] : memref<8x4x101xf32, #tpu.memory_space<vmem>>, vector<1x4x101xf32>
    %7 = vector.shape_cast %6 : vector<1x4x101xf32> to vector<4x101xf32>
    %8 = tpu.concatenate %4, %7, %5 in 1 : vector<4x23xf32>, vector<4x101xf32>, vector<4x27xf32> -> vector<4x151xf32>
    %9 = vector.extract_strided_slice %8 {offsets = [0, 0], sizes = [4, 128], strides = [1, 1]} : vector<4x151xf32> to vector<4x128xf32>
    %10 = vector.extract_strided_slice %8 {offsets = [0, 1], sizes = [4, 128], strides = [1, 1]} : vector<4x151xf32> to vector<4x128xf32>
    %11 = vector.extract_strided_slice %8 {offsets = [0, 2], sizes = [4, 128], strides = [1, 1]} : vector<4x151xf32> to vector<4x128xf32>
    %12 = vector.extract_strided_slice %8 {offsets = [0, 3], sizes = [4, 128], strides = [1, 1]} : vector<4x151xf32> to vector<4x128xf32>
    %13 = vector.extract_strided_slice %8 {offsets = [0, 4], sizes = [4, 128], strides = [1, 1]} : vector<4x151xf32> to vector<4x128xf32>
    %14 = vector.extract_strided_slice %8 {offsets = [0, 5], sizes = [4, 128], strides = [1, 1]} : vector<4x151xf32> to vector<4x128xf32>
    %15 = vector.extract_strided_slice %8 {offsets = [0, 6], sizes = [4, 128], strides = [1, 1]} : vector<4x151xf32> to vector<4x128xf32>
    %16 = vector.extract_strided_slice %8 {offsets = [0, 7], sizes = [4, 128], strides = [1, 1]} : vector<4x151xf32> to vector<4x128xf32>
    %17 = vector.extract_strided_slice %8 {offsets = [0, 8], sizes = [4, 128], strides = [1, 1]} : vector<4x151xf32> to vector<4x128xf32>
    %18 = vector.extract_strided_slice %8 {offsets = [0, 9], sizes = [4, 128], strides = [1, 1]} : vector<4x151xf32> to vector<4x128xf32>
    %19 = vector.extract_strided_slice %8 {offsets = [0, 10], sizes = [4, 128], strides = [1, 1]} : vector<4x151xf32> to vector<4x128xf32>
    %20 = vector.extract_strided_slice %8 {offsets = [0, 11], sizes = [4, 128], strides = [1, 1]} : vector<4x151xf32> to vector<4x128xf32>
    %21 = vector.extract_strided_slice %8 {offsets = [0, 12], sizes = [4, 128], strides = [1, 1]} : vector<4x151xf32> to vector<4x128xf32>
    %22 = vector.extract_strided_slice %8 {offsets = [0, 13], sizes = [4, 128], strides = [1, 1]} : vector<4x151xf32> to vector<4x128xf32>
    %23 = vector.extract_strided_slice %8 {offsets = [0, 14], sizes = [4, 128], strides = [1, 1]} : vector<4x151xf32> to vector<4x128xf32>
    %24 = vector.extract_strided_slice %8 {offsets = [0, 15], sizes = [4, 128], strides = [1, 1]} : vector<4x151xf32> to vector<4x128xf32>
    %25 = vector.extract_strided_slice %8 {offsets = [0, 16], sizes = [4, 128], strides = [1, 1]} : vector<4x151xf32> to vector<4x128xf32>
    %26 = vector.extract_strided_slice %8 {offsets = [0, 17], sizes = [4, 128], strides = [1, 1]} : vector<4x151xf32> to vector<4x128xf32>
    %27 = vector.extract_strided_slice %8 {offsets = [0, 18], sizes = [4, 128], strides = [1, 1]} : vector<4x151xf32> to vector<4x128xf32>
    %28 = vector.extract_strided_slice %8 {offsets = [0, 19], sizes = [4, 128], strides = [1, 1]} : vector<4x151xf32> to vector<4x128xf32>
    %29 = vector.extract_strided_slice %8 {offsets = [0, 20], sizes = [4, 128], strides = [1, 1]} : vector<4x151xf32> to vector<4x128xf32>
    %30 = vector.extract_strided_slice %8 {offsets = [0, 21], sizes = [4, 128], strides = [1, 1]} : vector<4x151xf32> to vector<4x128xf32>
    %31 = vector.extract_strided_slice %8 {offsets = [0, 22], sizes = [4, 128], strides = [1, 1]} : vector<4x151xf32> to vector<4x128xf32>
    %32 = vector.extract_strided_slice %8 {offsets = [0, 23], sizes = [4, 128], strides = [1, 1]} : vector<4x151xf32> to vector<4x128xf32>
    %33 = tpu.concatenate %9, %10, %11, %12, %13, %14, %15, %16, %17, %18, %19, %20, %21, %22, %23, %24 in 0 : vector<4x128xf32>, vector<4x128xf32>, vector<4x128xf32>, vector<4x128xf32>, vector<4x128xf32>, vector<4x128xf32>, vector<4x128xf32>, vector<4x128xf32>, vector<4x128xf32>, vector<4x128xf32>, vector<4x128xf32>, vector<4x128xf32>, vector<4x128xf32>, vector<4x128xf32>, vector<4x128xf32>, vector<4x128xf32> -> vector<64x128xf32>
    %34 = tpu.concatenate %25, %26, %27, %28, %29, %30, %31, %32 in 0 : vector<4x128xf32>, vector<4x128xf32>, vector<4x128xf32>, vector<4x128xf32>, vector<4x128xf32>, vector<4x128xf32>, vector<4x128xf32>, vector<4x128xf32> -> vector<32x128xf32>
    %35 = tpu.concatenate %33, %34 in 0 : vector<64x128xf32>, vector<32x128xf32> -> vector<96x128xf32>
    %c1 = arith.constant 1 : index
    %c0_11 = arith.constant 0 : index
    %c0_12 = arith.constant 0 : index
    %36 = vector.load %arg1[%c1, %c0_11, %c0_12] : memref<8x4x101xf32, #tpu.memory_space<vmem>>, vector<1x4x101xf32>
    %37 = vector.shape_cast %36 : vector<1x4x101xf32> to vector<4x101xf32>
    %38 = tpu.concatenate %4, %37, %5 in 1 : vector<4x23xf32>, vector<4x101xf32>, vector<4x27xf32> -> vector<4x151xf32>
    %39 = vector.extract_strided_slice %38 {offsets = [0, 0], sizes = [4, 128], strides = [1, 1]} : vector<4x151xf32> to vector<4x128xf32>
    %40 = vector.extract_strided_slice %38 {offsets = [0, 1], sizes = [4, 128], strides = [1, 1]} : vector<4x151xf32> to vector<4x128xf32>
    %41 = vector.extract_strided_slice %38 {offsets = [0, 2], sizes = [4, 128], strides = [1, 1]} : vector<4x151xf32> to vector<4x128xf32>
    %42 = vector.extract_strided_slice %38 {offsets = [0, 3], sizes = [4, 128], strides = [1, 1]} : vector<4x151xf32> to vector<4x128xf32>
    %43 = vector.extract_strided_slice %38 {offsets = [0, 4], sizes = [4, 128], strides = [1, 1]} : vector<4x151xf32> to vector<4x128xf32>
    %44 = vector.extract_strided_slice %38 {offsets = [0, 5], sizes = [4, 128], strides = [1, 1]} : vector<4x151xf32> to vector<4x128xf32>
    %45 = vector.extract_strided_slice %38 {offsets = [0, 6], sizes = [4, 128], strides = [1, 1]} : vector<4x151xf32> to vector<4x128xf32>
    %46 = vector.extract_strided_slice %38 {offsets = [0, 7], sizes = [4, 128], strides = [1, 1]} : vector<4x151xf32> to vector<4x128xf32>
    %47 = vector.extract_strided_slice %38 {offsets = [0, 8], sizes = [4, 128], strides = [1, 1]} : vector<4x151xf32> to vector<4x128xf32>
    %48 = vector.extract_strided_slice %38 {offsets = [0, 9], sizes = [4, 128], strides = [1, 1]} : vector<4x151xf32> to vector<4x128xf32>
    %49 = vector.extract_strided_slice %38 {offsets = [0, 10], sizes = [4, 128], strides = [1, 1]} : vector<4x151xf32> to vector<4x128xf32>
    %50 = vector.extract_strided_slice %38 {offsets = [0, 11], sizes = [4, 128], strides = [1, 1]} : vector<4x151xf32> to vector<4x128xf32>
    %51 = vector.extract_strided_slice %38 {offsets = [0, 12], sizes = [4, 128], strides = [1, 1]} : vector<4x151xf32> to vector<4x128xf32>
    %52 = vector.extract_strided_slice %38 {offsets = [0, 13], sizes = [4, 128], strides = [1, 1]} : vector<4x151xf32> to vector<4x128xf32>
    %53 = vector.extract_strided_slice %38 {offsets = [0, 14], sizes = [4, 128], strides = [1, 1]} : vector<4x151xf32> to vector<4x128xf32>
    %54 = vector.extract_strided_slice %38 {offsets = [0, 15], sizes = [4, 128], strides = [1, 1]} : vector<4x151xf32> to vector<4x128xf32>
    %55 = vector.extract_strided_slice %38 {offsets = [0, 16], sizes = [4, 128], strides = [1, 1]} : vector<4x151xf32> to vector<4x128xf32>
    %56 = vector.extract_strided_slice %38 {offsets = [0, 17], sizes = [4, 128], strides = [1, 1]} : vector<4x151xf32> to vector<4x128xf32>
    %57 = vector.extract_strided_slice %38 {offsets = [0, 18], sizes = [4, 128], strides = [1, 1]} : vector<4x151xf32> to vector<4x128xf32>
    %58 = vector.extract_strided_slice %38 {offsets = [0, 19], sizes = [4, 128], strides = [1, 1]} : vector<4x151xf32> to vector<4x128xf32>
    %59 = vector.extract_strided_slice %38 {offsets = [0, 20], sizes = [4, 128], strides = [1, 1]} : vector<4x151xf32> to vector<4x128xf32>
    %60 = vector.extract_strided_slice %38 {offsets = [0, 21], sizes = [4, 128], strides = [1, 1]} : vector<4x151xf32> to vector<4x128xf32>
    %61 = vector.extract_strided_slice %38 {offsets = [0, 22], sizes = [4, 128], strides = [1, 1]} : vector<4x151xf32> to vector<4x128xf32>
    %62 = vector.extract_strided_slice %38 {offsets = [0, 23], sizes = [4, 128], strides = [1, 1]} : vector<4x151xf32> to vector<4x128xf32>
    %63 = tpu.concatenate %39, %40, %41, %42, %43, %44, %45, %46, %47, %48, %49, %50, %51, %52, %53, %54 in 0 : vector<4x128xf32>, vector<4x128xf32>, vector<4x128xf32>, vector<4x128xf32>, vector<4x128xf32>, vector<4x128xf32>, vector<4x128xf32>, vector<4x128xf32>, vector<4x128xf32>, vector<4x128xf32>, vector<4x128xf32>, vector<4x128xf32>, vector<4x128xf32>, vector<4x128xf32>, vector<4x128xf32>, vector<4x128xf32> -> vector<64x128xf32>
    %64 = tpu.concatenate %55, %56, %57, %58, %59, %60, %61, %62 in 0 : vector<4x128xf32>, vector<4x128xf32>, vector<4x128xf32>, vector<4x128xf32>, vector<4x128xf32>, vector<4x128xf32>, vector<4x128xf32>, vector<4x128xf32> -> vector<32x128xf32>
    %65 = tpu.concatenate %63, %64 in 0 : vector<64x128xf32>, vector<32x128xf32> -> vector<96x128xf32>
    %c2 = arith.constant 2 : index
    %c0_13 = arith.constant 0 : index
    %c0_14 = arith.constant 0 : index
    %66 = vector.load %arg1[%c2, %c0_13, %c0_14] : memref<8x4x101xf32, #tpu.memory_space<vmem>>, vector<1x4x101xf32>
    %67 = vector.shape_cast %66 : vector<1x4x101xf32> to vector<4x101xf32>
    %68 = tpu.concatenate %4, %67, %5 in 1 : vector<4x23xf32>, vector<4x101xf32>, vector<4x27xf32> -> vector<4x151xf32>
    %69 = vector.extract_strided_slice %68 {offsets = [0, 0], sizes = [4, 128], strides = [1, 1]} : vector<4x151xf32> to vector<4x128xf32>
    %70 = vector.extract_strided_slice %68 {offsets = [0, 1], sizes = [4, 128], strides = [1, 1]} : vector<4x151xf32> to vector<4x128xf32>
    %71 = vector.extract_strided_slice %68 {offsets = [0, 2], sizes = [4, 128], strides = [1, 1]} : vector<4x151xf32> to vector<4x128xf32>
    %72 = vector.extract_strided_slice %68 {offsets = [0, 3], sizes = [4, 128], strides = [1, 1]} : vector<4x151xf32> to vector<4x128xf32>
    %73 = vector.extract_strided_slice %68 {offsets = [0, 4], sizes = [4, 128], strides = [1, 1]} : vector<4x151xf32> to vector<4x128xf32>
    %74 = vector.extract_strided_slice %68 {offsets = [0, 5], sizes = [4, 128], strides = [1, 1]} : vector<4x151xf32> to vector<4x128xf32>
    %75 = vector.extract_strided_slice %68 {offsets = [0, 6], sizes = [4, 128], strides = [1, 1]} : vector<4x151xf32> to vector<4x128xf32>
    %76 = vector.extract_strided_slice %68 {offsets = [0, 7], sizes = [4, 128], strides = [1, 1]} : vector<4x151xf32> to vector<4x128xf32>
    %77 = vector.extract_strided_slice %68 {offsets = [0, 8], sizes = [4, 128], strides = [1, 1]} : vector<4x151xf32> to vector<4x128xf32>
    %78 = vector.extract_strided_slice %68 {offsets = [0, 9], sizes = [4, 128], strides = [1, 1]} : vector<4x151xf32> to vector<4x128xf32>
    %79 = vector.extract_strided_slice %68 {offsets = [0, 10], sizes = [4, 128], strides = [1, 1]} : vector<4x151xf32> to vector<4x128xf32>
    %80 = vector.extract_strided_slice %68 {offsets = [0, 11], sizes = [4, 128], strides = [1, 1]} : vector<4x151xf32> to vector<4x128xf32>
    %81 = vector.extract_strided_slice %68 {offsets = [0, 12], sizes = [4, 128], strides = [1, 1]} : vector<4x151xf32> to vector<4x128xf32>
    %82 = vector.extract_strided_slice %68 {offsets = [0, 13], sizes = [4, 128], strides = [1, 1]} : vector<4x151xf32> to vector<4x128xf32>
    %83 = vector.extract_strided_slice %68 {offsets = [0, 14], sizes = [4, 128], strides = [1, 1]} : vector<4x151xf32> to vector<4x128xf32>
    %84 = vector.extract_strided_slice %68 {offsets = [0, 15], sizes = [4, 128], strides = [1, 1]} : vector<4x151xf32> to vector<4x128xf32>
    %85 = vector.extract_strided_slice %68 {offsets = [0, 16], sizes = [4, 128], strides = [1, 1]} : vector<4x151xf32> to vector<4x128xf32>
    %86 = vector.extract_strided_slice %68 {offsets = [0, 17], sizes = [4, 128], strides = [1, 1]} : vector<4x151xf32> to vector<4x128xf32>
    %87 = vector.extract_strided_slice %68 {offsets = [0, 18], sizes = [4, 128], strides = [1, 1]} : vector<4x151xf32> to vector<4x128xf32>
    %88 = vector.extract_strided_slice %68 {offsets = [0, 19], sizes = [4, 128], strides = [1, 1]} : vector<4x151xf32> to vector<4x128xf32>
    %89 = vector.extract_strided_slice %68 {offsets = [0, 20], sizes = [4, 128], strides = [1, 1]} : vector<4x151xf32> to vector<4x128xf32>
    %90 = vector.extract_strided_slice %68 {offsets = [0, 21], sizes = [4, 128], strides = [1, 1]} : vector<4x151xf32> to vector<4x128xf32>
    %91 = vector.extract_strided_slice %68 {offsets = [0, 22], sizes = [4, 128], strides = [1, 1]} : vector<4x151xf32> to vector<4x128xf32>
    %92 = vector.extract_strided_slice %68 {offsets = [0, 23], sizes = [4, 128], strides = [1, 1]} : vector<4x151xf32> to vector<4x128xf32>
    %93 = tpu.concatenate %69, %70, %71, %72, %73, %74, %75, %76, %77, %78, %79, %80, %81, %82, %83, %84 in 0 : vector<4x128xf32>, vector<4x128xf32>, vector<4x128xf32>, vector<4x128xf32>, vector<4x128xf32>, vector<4x128xf32>, vector<4x128xf32>, vector<4x128xf32>, vector<4x128xf32>, vector<4x128xf32>, vector<4x128xf32>, vector<4x128xf32>, vector<4x128xf32>, vector<4x128xf32>, vector<4x128xf32>, vector<4x128xf32> -> vector<64x128xf32>
    %94 = tpu.concatenate %85, %86, %87, %88, %89, %90, %91, %92 in 0 : vector<4x128xf32>, vector<4x128xf32>, vector<4x128xf32>, vector<4x128xf32>, vector<4x128xf32>, vector<4x128xf32>, vector<4x128xf32>, vector<4x128xf32> -> vector<32x128xf32>
    %95 = tpu.concatenate %93, %94 in 0 : vector<64x128xf32>, vector<32x128xf32> -> vector<96x128xf32>
    %c3 = arith.constant 3 : index
    %c0_15 = arith.constant 0 : index
    %c0_16 = arith.constant 0 : index
    %96 = vector.load %arg1[%c3, %c0_15, %c0_16] : memref<8x4x101xf32, #tpu.memory_space<vmem>>, vector<1x4x101xf32>
    %97 = vector.shape_cast %96 : vector<1x4x101xf32> to vector<4x101xf32>
    %98 = tpu.concatenate %4, %97, %5 in 1 : vector<4x23xf32>, vector<4x101xf32>, vector<4x27xf32> -> vector<4x151xf32>
    %99 = vector.extract_strided_slice %98 {offsets = [0, 0], sizes = [4, 128], strides = [1, 1]} : vector<4x151xf32> to vector<4x128xf32>
    %100 = vector.extract_strided_slice %98 {offsets = [0, 1], sizes = [4, 128], strides = [1, 1]} : vector<4x151xf32> to vector<4x128xf32>
    %101 = vector.extract_strided_slice %98 {offsets = [0, 2], sizes = [4, 128], strides = [1, 1]} : vector<4x151xf32> to vector<4x128xf32>
    %102 = vector.extract_strided_slice %98 {offsets = [0, 3], sizes = [4, 128], strides = [1, 1]} : vector<4x151xf32> to vector<4x128xf32>
    %103 = vector.extract_strided_slice %98 {offsets = [0, 4], sizes = [4, 128], strides = [1, 1]} : vector<4x151xf32> to vector<4x128xf32>
    %104 = vector.extract_strided_slice %98 {offsets = [0, 5], sizes = [4, 128], strides = [1, 1]} : vector<4x151xf32> to vector<4x128xf32>
    %105 = vector.extract_strided_slice %98 {offsets = [0, 6], sizes = [4, 128], strides = [1, 1]} : vector<4x151xf32> to vector<4x128xf32>
    %106 = vector.extract_strided_slice %98 {offsets = [0, 7], sizes = [4, 128], strides = [1, 1]} : vector<4x151xf32> to vector<4x128xf32>
    %107 = vector.extract_strided_slice %98 {offsets = [0, 8], sizes = [4, 128], strides = [1, 1]} : vector<4x151xf32> to vector<4x128xf32>
    %108 = vector.extract_strided_slice %98 {offsets = [0, 9], sizes = [4, 128], strides = [1, 1]} : vector<4x151xf32> to vector<4x128xf32>
    %109 = vector.extract_strided_slice %98 {offsets = [0, 10], sizes = [4, 128], strides = [1, 1]} : vector<4x151xf32> to vector<4x128xf32>
    %110 = vector.extract_strided_slice %98 {offsets = [0, 11], sizes = [4, 128], strides = [1, 1]} : vector<4x151xf32> to vector<4x128xf32>
    %111 = vector.extract_strided_slice %98 {offsets = [0, 12], sizes = [4, 128], strides = [1, 1]} : vector<4x151xf32> to vector<4x128xf32>
    %112 = vector.extract_strided_slice %98 {offsets = [0, 13], sizes = [4, 128], strides = [1, 1]} : vector<4x151xf32> to vector<4x128xf32>
    %113 = vector.extract_strided_slice %98 {offsets = [0, 14], sizes = [4, 128], strides = [1, 1]} : vector<4x151xf32> to vector<4x128xf32>
    %114 = vector.extract_strided_slice %98 {offsets = [0, 15], sizes = [4, 128], strides = [1, 1]} : vector<4x151xf32> to vector<4x128xf32>
    %115 = vector.extract_strided_slice %98 {offsets = [0, 16], sizes = [4, 128], strides = [1, 1]} : vector<4x151xf32> to vector<4x128xf32>
    %116 = vector.extract_strided_slice %98 {offsets = [0, 17], sizes = [4, 128], strides = [1, 1]} : vector<4x151xf32> to vector<4x128xf32>
    %117 = vector.extract_strided_slice %98 {offsets = [0, 18], sizes = [4, 128], strides = [1, 1]} : vector<4x151xf32> to vector<4x128xf32>
    %118 = vector.extract_strided_slice %98 {offsets = [0, 19], sizes = [4, 128], strides = [1, 1]} : vector<4x151xf32> to vector<4x128xf32>
    %119 = vector.extract_strided_slice %98 {offsets = [0, 20], sizes = [4, 128], strides = [1, 1]} : vector<4x151xf32> to vector<4x128xf32>
    %120 = vector.extract_strided_slice %98 {offsets = [0, 21], sizes = [4, 128], strides = [1, 1]} : vector<4x151xf32> to vector<4x128xf32>
    %121 = vector.extract_strided_slice %98 {offsets = [0, 22], sizes = [4, 128], strides = [1, 1]} : vector<4x151xf32> to vector<4x128xf32>
    %122 = vector.extract_strided_slice %98 {offsets = [0, 23], sizes = [4, 128], strides = [1, 1]} : vector<4x151xf32> to vector<4x128xf32>
    %123 = tpu.concatenate %99, %100, %101, %102, %103, %104, %105, %106, %107, %108, %109, %110, %111, %112, %113, %114 in 0 : vector<4x128xf32>, vector<4x128xf32>, vector<4x128xf32>, vector<4x128xf32>, vector<4x128xf32>, vector<4x128xf32>, vector<4x128xf32>, vector<4x128xf32>, vector<4x128xf32>, vector<4x128xf32>, vector<4x128xf32>, vector<4x128xf32>, vector<4x128xf32>, vector<4x128xf32>, vector<4x128xf32>, vector<4x128xf32> -> vector<64x128xf32>
    %124 = tpu.concatenate %115, %116, %117, %118, %119, %120, %121, %122 in 0 : vector<4x128xf32>, vector<4x128xf32>, vector<4x128xf32>, vector<4x128xf32>, vector<4x128xf32>, vector<4x128xf32>, vector<4x128xf32>, vector<4x128xf32> -> vector<32x128xf32>
    %125 = tpu.concatenate %123, %124 in 0 : vector<64x128xf32>, vector<32x128xf32> -> vector<96x128xf32>
    %c4 = arith.constant 4 : index
    %c0_17 = arith.constant 0 : index
    %c0_18 = arith.constant 0 : index
    %126 = vector.load %arg1[%c4, %c0_17, %c0_18] : memref<8x4x101xf32, #tpu.memory_space<vmem>>, vector<1x4x101xf32>
    %127 = vector.shape_cast %126 : vector<1x4x101xf32> to vector<4x101xf32>
    %128 = tpu.concatenate %4, %127, %5 in 1 : vector<4x23xf32>, vector<4x101xf32>, vector<4x27xf32> -> vector<4x151xf32>
    %129 = vector.extract_strided_slice %128 {offsets = [0, 0], sizes = [4, 128], strides = [1, 1]} : vector<4x151xf32> to vector<4x128xf32>
    %130 = vector.extract_strided_slice %128 {offsets = [0, 1], sizes = [4, 128], strides = [1, 1]} : vector<4x151xf32> to vector<4x128xf32>
    %131 = vector.extract_strided_slice %128 {offsets = [0, 2], sizes = [4, 128], strides = [1, 1]} : vector<4x151xf32> to vector<4x128xf32>
    %132 = vector.extract_strided_slice %128 {offsets = [0, 3], sizes = [4, 128], strides = [1, 1]} : vector<4x151xf32> to vector<4x128xf32>
    %133 = vector.extract_strided_slice %128 {offsets = [0, 4], sizes = [4, 128], strides = [1, 1]} : vector<4x151xf32> to vector<4x128xf32>
    %134 = vector.extract_strided_slice %128 {offsets = [0, 5], sizes = [4, 128], strides = [1, 1]} : vector<4x151xf32> to vector<4x128xf32>
    %135 = vector.extract_strided_slice %128 {offsets = [0, 6], sizes = [4, 128], strides = [1, 1]} : vector<4x151xf32> to vector<4x128xf32>
    %136 = vector.extract_strided_slice %128 {offsets = [0, 7], sizes = [4, 128], strides = [1, 1]} : vector<4x151xf32> to vector<4x128xf32>
    %137 = vector.extract_strided_slice %128 {offsets = [0, 8], sizes = [4, 128], strides = [1, 1]} : vector<4x151xf32> to vector<4x128xf32>
    %138 = vector.extract_strided_slice %128 {offsets = [0, 9], sizes = [4, 128], strides = [1, 1]} : vector<4x151xf32> to vector<4x128xf32>
    %139 = vector.extract_strided_slice %128 {offsets = [0, 10], sizes = [4, 128], strides = [1, 1]} : vector<4x151xf32> to vector<4x128xf32>
    %140 = vector.extract_strided_slice %128 {offsets = [0, 11], sizes = [4, 128], strides = [1, 1]} : vector<4x151xf32> to vector<4x128xf32>
    %141 = vector.extract_strided_slice %128 {offsets = [0, 12], sizes = [4, 128], strides = [1, 1]} : vector<4x151xf32> to vector<4x128xf32>
    %142 = vector.extract_strided_slice %128 {offsets = [0, 13], sizes = [4, 128], strides = [1, 1]} : vector<4x151xf32> to vector<4x128xf32>
    %143 = vector.extract_strided_slice %128 {offsets = [0, 14], sizes = [4, 128], strides = [1, 1]} : vector<4x151xf32> to vector<4x128xf32>
    %144 = vector.extract_strided_slice %128 {offsets = [0, 15], sizes = [4, 128], strides = [1, 1]} : vector<4x151xf32> to vector<4x128xf32>
    %145 = vector.extract_strided_slice %128 {offsets = [0, 16], sizes = [4, 128], strides = [1, 1]} : vector<4x151xf32> to vector<4x128xf32>
    %146 = vector.extract_strided_slice %128 {offsets = [0, 17], sizes = [4, 128], strides = [1, 1]} : vector<4x151xf32> to vector<4x128xf32>
    %147 = vector.extract_strided_slice %128 {offsets = [0, 18], sizes = [4, 128], strides = [1, 1]} : vector<4x151xf32> to vector<4x128xf32>
    %148 = vector.extract_strided_slice %128 {offsets = [0, 19], sizes = [4, 128], strides = [1, 1]} : vector<4x151xf32> to vector<4x128xf32>
    %149 = vector.extract_strided_slice %128 {offsets = [0, 20], sizes = [4, 128], strides = [1, 1]} : vector<4x151xf32> to vector<4x128xf32>
    %150 = vector.extract_strided_slice %128 {offsets = [0, 21], sizes = [4, 128], strides = [1, 1]} : vector<4x151xf32> to vector<4x128xf32>
    %151 = vector.extract_strided_slice %128 {offsets = [0, 22], sizes = [4, 128], strides = [1, 1]} : vector<4x151xf32> to vector<4x128xf32>
    %152 = vector.extract_strided_slice %128 {offsets = [0, 23], sizes = [4, 128], strides = [1, 1]} : vector<4x151xf32> to vector<4x128xf32>
    %153 = tpu.concatenate %129, %130, %131, %132, %133, %134, %135, %136, %137, %138, %139, %140, %141, %142, %143, %144 in 0 : vector<4x128xf32>, vector<4x128xf32>, vector<4x128xf32>, vector<4x128xf32>, vector<4x128xf32>, vector<4x128xf32>, vector<4x128xf32>, vector<4x128xf32>, vector<4x128xf32>, vector<4x128xf32>, vector<4x128xf32>, vector<4x128xf32>, vector<4x128xf32>, vector<4x128xf32>, vector<4x128xf32>, vector<4x128xf32> -> vector<64x128xf32>
    %154 = tpu.concatenate %145, %146, %147, %148, %149, %150, %151, %152 in 0 : vector<4x128xf32>, vector<4x128xf32>, vector<4x128xf32>, vector<4x128xf32>, vector<4x128xf32>, vector<4x128xf32>, vector<4x128xf32>, vector<4x128xf32> -> vector<32x128xf32>
    %155 = tpu.concatenate %153, %154 in 0 : vector<64x128xf32>, vector<32x128xf32> -> vector<96x128xf32>
    %c5 = arith.constant 5 : index
    %c0_19 = arith.constant 0 : index
    %c0_20 = arith.constant 0 : index
    %156 = vector.load %arg1[%c5, %c0_19, %c0_20] : memref<8x4x101xf32, #tpu.memory_space<vmem>>, vector<1x4x101xf32>
    %157 = vector.shape_cast %156 : vector<1x4x101xf32> to vector<4x101xf32>
    %158 = tpu.concatenate %4, %157, %5 in 1 : vector<4x23xf32>, vector<4x101xf32>, vector<4x27xf32> -> vector<4x151xf32>
    %159 = vector.extract_strided_slice %158 {offsets = [0, 0], sizes = [4, 128], strides = [1, 1]} : vector<4x151xf32> to vector<4x128xf32>
    %160 = vector.extract_strided_slice %158 {offsets = [0, 1], sizes = [4, 128], strides = [1, 1]} : vector<4x151xf32> to vector<4x128xf32>
    %161 = vector.extract_strided_slice %158 {offsets = [0, 2], sizes = [4, 128], strides = [1, 1]} : vector<4x151xf32> to vector<4x128xf32>
    %162 = vector.extract_strided_slice %158 {offsets = [0, 3], sizes = [4, 128], strides = [1, 1]} : vector<4x151xf32> to vector<4x128xf32>
    %163 = vector.extract_strided_slice %158 {offsets = [0, 4], sizes = [4, 128], strides = [1, 1]} : vector<4x151xf32> to vector<4x128xf32>
    %164 = vector.extract_strided_slice %158 {offsets = [0, 5], sizes = [4, 128], strides = [1, 1]} : vector<4x151xf32> to vector<4x128xf32>
    %165 = vector.extract_strided_slice %158 {offsets = [0, 6], sizes = [4, 128], strides = [1, 1]} : vector<4x151xf32> to vector<4x128xf32>
    %166 = vector.extract_strided_slice %158 {offsets = [0, 7], sizes = [4, 128], strides = [1, 1]} : vector<4x151xf32> to vector<4x128xf32>
    %167 = vector.extract_strided_slice %158 {offsets = [0, 8], sizes = [4, 128], strides = [1, 1]} : vector<4x151xf32> to vector<4x128xf32>
    %168 = vector.extract_strided_slice %158 {offsets = [0, 9], sizes = [4, 128], strides = [1, 1]} : vector<4x151xf32> to vector<4x128xf32>
    %169 = vector.extract_strided_slice %158 {offsets = [0, 10], sizes = [4, 128], strides = [1, 1]} : vector<4x151xf32> to vector<4x128xf32>
    %170 = vector.extract_strided_slice %158 {offsets = [0, 11], sizes = [4, 128], strides = [1, 1]} : vector<4x151xf32> to vector<4x128xf32>
    %171 = vector.extract_strided_slice %158 {offsets = [0, 12], sizes = [4, 128], strides = [1, 1]} : vector<4x151xf32> to vector<4x128xf32>
    %172 = vector.extract_strided_slice %158 {offsets = [0, 13], sizes = [4, 128], strides = [1, 1]} : vector<4x151xf32> to vector<4x128xf32>
    %173 = vector.extract_strided_slice %158 {offsets = [0, 14], sizes = [4, 128], strides = [1, 1]} : vector<4x151xf32> to vector<4x128xf32>
    %174 = vector.extract_strided_slice %158 {offsets = [0, 15], sizes = [4, 128], strides = [1, 1]} : vector<4x151xf32> to vector<4x128xf32>
    %175 = vector.extract_strided_slice %158 {offsets = [0, 16], sizes = [4, 128], strides = [1, 1]} : vector<4x151xf32> to vector<4x128xf32>
    %176 = vector.extract_strided_slice %158 {offsets = [0, 17], sizes = [4, 128], strides = [1, 1]} : vector<4x151xf32> to vector<4x128xf32>
    %177 = vector.extract_strided_slice %158 {offsets = [0, 18], sizes = [4, 128], strides = [1, 1]} : vector<4x151xf32> to vector<4x128xf32>
    %178 = vector.extract_strided_slice %158 {offsets = [0, 19], sizes = [4, 128], strides = [1, 1]} : vector<4x151xf32> to vector<4x128xf32>
    %179 = vector.extract_strided_slice %158 {offsets = [0, 20], sizes = [4, 128], strides = [1, 1]} : vector<4x151xf32> to vector<4x128xf32>
    %180 = vector.extract_strided_slice %158 {offsets = [0, 21], sizes = [4, 128], strides = [1, 1]} : vector<4x151xf32> to vector<4x128xf32>
    %181 = vector.extract_strided_slice %158 {offsets = [0, 22], sizes = [4, 128], strides = [1, 1]} : vector<4x151xf32> to vector<4x128xf32>
    %182 = vector.extract_strided_slice %158 {offsets = [0, 23], sizes = [4, 128], strides = [1, 1]} : vector<4x151xf32> to vector<4x128xf32>
    %183 = tpu.concatenate %159, %160, %161, %162, %163, %164, %165, %166, %167, %168, %169, %170, %171, %172, %173, %174 in 0 : vector<4x128xf32>, vector<4x128xf32>, vector<4x128xf32>, vector<4x128xf32>, vector<4x128xf32>, vector<4x128xf32>, vector<4x128xf32>, vector<4x128xf32>, vector<4x128xf32>, vector<4x128xf32>, vector<4x128xf32>, vector<4x128xf32>, vector<4x128xf32>, vector<4x128xf32>, vector<4x128xf32>, vector<4x128xf32> -> vector<64x128xf32>
    %184 = tpu.concatenate %175, %176, %177, %178, %179, %180, %181, %182 in 0 : vector<4x128xf32>, vector<4x128xf32>, vector<4x128xf32>, vector<4x128xf32>, vector<4x128xf32>, vector<4x128xf32>, vector<4x128xf32>, vector<4x128xf32> -> vector<32x128xf32>
    %185 = tpu.concatenate %183, %184 in 0 : vector<64x128xf32>, vector<32x128xf32> -> vector<96x128xf32>
    %c6 = arith.constant 6 : index
    %c0_21 = arith.constant 0 : index
    %c0_22 = arith.constant 0 : index
    %186 = vector.load %arg1[%c6, %c0_21, %c0_22] : memref<8x4x101xf32, #tpu.memory_space<vmem>>, vector<1x4x101xf32>
    %187 = vector.shape_cast %186 : vector<1x4x101xf32> to vector<4x101xf32>
    %188 = tpu.concatenate %4, %187, %5 in 1 : vector<4x23xf32>, vector<4x101xf32>, vector<4x27xf32> -> vector<4x151xf32>
    %189 = vector.extract_strided_slice %188 {offsets = [0, 0], sizes = [4, 128], strides = [1, 1]} : vector<4x151xf32> to vector<4x128xf32>
    %190 = vector.extract_strided_slice %188 {offsets = [0, 1], sizes = [4, 128], strides = [1, 1]} : vector<4x151xf32> to vector<4x128xf32>
    %191 = vector.extract_strided_slice %188 {offsets = [0, 2], sizes = [4, 128], strides = [1, 1]} : vector<4x151xf32> to vector<4x128xf32>
    %192 = vector.extract_strided_slice %188 {offsets = [0, 3], sizes = [4, 128], strides = [1, 1]} : vector<4x151xf32> to vector<4x128xf32>
    %193 = vector.extract_strided_slice %188 {offsets = [0, 4], sizes = [4, 128], strides = [1, 1]} : vector<4x151xf32> to vector<4x128xf32>
    %194 = vector.extract_strided_slice %188 {offsets = [0, 5], sizes = [4, 128], strides = [1, 1]} : vector<4x151xf32> to vector<4x128xf32>
    %195 = vector.extract_strided_slice %188 {offsets = [0, 6], sizes = [4, 128], strides = [1, 1]} : vector<4x151xf32> to vector<4x128xf32>
    %196 = vector.extract_strided_slice %188 {offsets = [0, 7], sizes = [4, 128], strides = [1, 1]} : vector<4x151xf32> to vector<4x128xf32>
    %197 = vector.extract_strided_slice %188 {offsets = [0, 8], sizes = [4, 128], strides = [1, 1]} : vector<4x151xf32> to vector<4x128xf32>
    %198 = vector.extract_strided_slice %188 {offsets = [0, 9], sizes = [4, 128], strides = [1, 1]} : vector<4x151xf32> to vector<4x128xf32>
    %199 = vector.extract_strided_slice %188 {offsets = [0, 10], sizes = [4, 128], strides = [1, 1]} : vector<4x151xf32> to vector<4x128xf32>
    %200 = vector.extract_strided_slice %188 {offsets = [0, 11], sizes = [4, 128], strides = [1, 1]} : vector<4x151xf32> to vector<4x128xf32>
    %201 = vector.extract_strided_slice %188 {offsets = [0, 12], sizes = [4, 128], strides = [1, 1]} : vector<4x151xf32> to vector<4x128xf32>
    %202 = vector.extract_strided_slice %188 {offsets = [0, 13], sizes = [4, 128], strides = [1, 1]} : vector<4x151xf32> to vector<4x128xf32>
    %203 = vector.extract_strided_slice %188 {offsets = [0, 14], sizes = [4, 128], strides = [1, 1]} : vector<4x151xf32> to vector<4x128xf32>
    %204 = vector.extract_strided_slice %188 {offsets = [0, 15], sizes = [4, 128], strides = [1, 1]} : vector<4x151xf32> to vector<4x128xf32>
    %205 = vector.extract_strided_slice %188 {offsets = [0, 16], sizes = [4, 128], strides = [1, 1]} : vector<4x151xf32> to vector<4x128xf32>
    %206 = vector.extract_strided_slice %188 {offsets = [0, 17], sizes = [4, 128], strides = [1, 1]} : vector<4x151xf32> to vector<4x128xf32>
    %207 = vector.extract_strided_slice %188 {offsets = [0, 18], sizes = [4, 128], strides = [1, 1]} : vector<4x151xf32> to vector<4x128xf32>
    %208 = vector.extract_strided_slice %188 {offsets = [0, 19], sizes = [4, 128], strides = [1, 1]} : vector<4x151xf32> to vector<4x128xf32>
    %209 = vector.extract_strided_slice %188 {offsets = [0, 20], sizes = [4, 128], strides = [1, 1]} : vector<4x151xf32> to vector<4x128xf32>
    %210 = vector.extract_strided_slice %188 {offsets = [0, 21], sizes = [4, 128], strides = [1, 1]} : vector<4x151xf32> to vector<4x128xf32>
    %211 = vector.extract_strided_slice %188 {offsets = [0, 22], sizes = [4, 128], strides = [1, 1]} : vector<4x151xf32> to vector<4x128xf32>
    %212 = vector.extract_strided_slice %188 {offsets = [0, 23], sizes = [4, 128], strides = [1, 1]} : vector<4x151xf32> to vector<4x128xf32>
    %213 = tpu.concatenate %189, %190, %191, %192, %193, %194, %195, %196, %197, %198, %199, %200, %201, %202, %203, %204 in 0 : vector<4x128xf32>, vector<4x128xf32>, vector<4x128xf32>, vector<4x128xf32>, vector<4x128xf32>, vector<4x128xf32>, vector<4x128xf32>, vector<4x128xf32>, vector<4x128xf32>, vector<4x128xf32>, vector<4x128xf32>, vector<4x128xf32>, vector<4x128xf32>, vector<4x128xf32>, vector<4x128xf32>, vector<4x128xf32> -> vector<64x128xf32>
    %214 = tpu.concatenate %205, %206, %207, %208, %209, %210, %211, %212 in 0 : vector<4x128xf32>, vector<4x128xf32>, vector<4x128xf32>, vector<4x128xf32>, vector<4x128xf32>, vector<4x128xf32>, vector<4x128xf32>, vector<4x128xf32> -> vector<32x128xf32>
    %215 = tpu.concatenate %213, %214 in 0 : vector<64x128xf32>, vector<32x128xf32> -> vector<96x128xf32>
    %c7 = arith.constant 7 : index
    %c0_23 = arith.constant 0 : index
    %c0_24 = arith.constant 0 : index
    %216 = vector.load %arg1[%c7, %c0_23, %c0_24] : memref<8x4x101xf32, #tpu.memory_space<vmem>>, vector<1x4x101xf32>
    %217 = vector.shape_cast %216 : vector<1x4x101xf32> to vector<4x101xf32>
    %218 = tpu.concatenate %4, %217, %5 in 1 : vector<4x23xf32>, vector<4x101xf32>, vector<4x27xf32> -> vector<4x151xf32>
    %219 = vector.extract_strided_slice %218 {offsets = [0, 0], sizes = [4, 128], strides = [1, 1]} : vector<4x151xf32> to vector<4x128xf32>
    %220 = vector.extract_strided_slice %218 {offsets = [0, 1], sizes = [4, 128], strides = [1, 1]} : vector<4x151xf32> to vector<4x128xf32>
    %221 = vector.extract_strided_slice %218 {offsets = [0, 2], sizes = [4, 128], strides = [1, 1]} : vector<4x151xf32> to vector<4x128xf32>
    %222 = vector.extract_strided_slice %218 {offsets = [0, 3], sizes = [4, 128], strides = [1, 1]} : vector<4x151xf32> to vector<4x128xf32>
    %223 = vector.extract_strided_slice %218 {offsets = [0, 4], sizes = [4, 128], strides = [1, 1]} : vector<4x151xf32> to vector<4x128xf32>
    %224 = vector.extract_strided_slice %218 {offsets = [0, 5], sizes = [4, 128], strides = [1, 1]} : vector<4x151xf32> to vector<4x128xf32>
    %225 = vector.extract_strided_slice %218 {offsets = [0, 6], sizes = [4, 128], strides = [1, 1]} : vector<4x151xf32> to vector<4x128xf32>
    %226 = vector.extract_strided_slice %218 {offsets = [0, 7], sizes = [4, 128], strides = [1, 1]} : vector<4x151xf32> to vector<4x128xf32>
    %227 = vector.extract_strided_slice %218 {offsets = [0, 8], sizes = [4, 128], strides = [1, 1]} : vector<4x151xf32> to vector<4x128xf32>
    %228 = vector.extract_strided_slice %218 {offsets = [0, 9], sizes = [4, 128], strides = [1, 1]} : vector<4x151xf32> to vector<4x128xf32>
    %229 = vector.extract_strided_slice %218 {offsets = [0, 10], sizes = [4, 128], strides = [1, 1]} : vector<4x151xf32> to vector<4x128xf32>
    %230 = vector.extract_strided_slice %218 {offsets = [0, 11], sizes = [4, 128], strides = [1, 1]} : vector<4x151xf32> to vector<4x128xf32>
    %231 = vector.extract_strided_slice %218 {offsets = [0, 12], sizes = [4, 128], strides = [1, 1]} : vector<4x151xf32> to vector<4x128xf32>
    %232 = vector.extract_strided_slice %218 {offsets = [0, 13], sizes = [4, 128], strides = [1, 1]} : vector<4x151xf32> to vector<4x128xf32>
    %233 = vector.extract_strided_slice %218 {offsets = [0, 14], sizes = [4, 128], strides = [1, 1]} : vector<4x151xf32> to vector<4x128xf32>
    %234 = vector.extract_strided_slice %218 {offsets = [0, 15], sizes = [4, 128], strides = [1, 1]} : vector<4x151xf32> to vector<4x128xf32>
    %235 = vector.extract_strided_slice %218 {offsets = [0, 16], sizes = [4, 128], strides = [1, 1]} : vector<4x151xf32> to vector<4x128xf32>
    %236 = vector.extract_strided_slice %218 {offsets = [0, 17], sizes = [4, 128], strides = [1, 1]} : vector<4x151xf32> to vector<4x128xf32>
    %237 = vector.extract_strided_slice %218 {offsets = [0, 18], sizes = [4, 128], strides = [1, 1]} : vector<4x151xf32> to vector<4x128xf32>
    %238 = vector.extract_strided_slice %218 {offsets = [0, 19], sizes = [4, 128], strides = [1, 1]} : vector<4x151xf32> to vector<4x128xf32>
    %239 = vector.extract_strided_slice %218 {offsets = [0, 20], sizes = [4, 128], strides = [1, 1]} : vector<4x151xf32> to vector<4x128xf32>
    %240 = vector.extract_strided_slice %218 {offsets = [0, 21], sizes = [4, 128], strides = [1, 1]} : vector<4x151xf32> to vector<4x128xf32>
    %241 = vector.extract_strided_slice %218 {offsets = [0, 22], sizes = [4, 128], strides = [1, 1]} : vector<4x151xf32> to vector<4x128xf32>
    %242 = vector.extract_strided_slice %218 {offsets = [0, 23], sizes = [4, 128], strides = [1, 1]} : vector<4x151xf32> to vector<4x128xf32>
    %243 = tpu.concatenate %219, %220, %221, %222, %223, %224, %225, %226, %227, %228, %229, %230, %231, %232, %233, %234 in 0 : vector<4x128xf32>, vector<4x128xf32>, vector<4x128xf32>, vector<4x128xf32>, vector<4x128xf32>, vector<4x128xf32>, vector<4x128xf32>, vector<4x128xf32>, vector<4x128xf32>, vector<4x128xf32>, vector<4x128xf32>, vector<4x128xf32>, vector<4x128xf32>, vector<4x128xf32>, vector<4x128xf32>, vector<4x128xf32> -> vector<64x128xf32>
    %244 = tpu.concatenate %235, %236, %237, %238, %239, %240, %241, %242 in 0 : vector<4x128xf32>, vector<4x128xf32>, vector<4x128xf32>, vector<4x128xf32>, vector<4x128xf32>, vector<4x128xf32>, vector<4x128xf32>, vector<4x128xf32> -> vector<32x128xf32>
    %245 = tpu.concatenate %243, %244 in 0 : vector<64x128xf32>, vector<32x128xf32> -> vector<96x128xf32>
    %246 = tpu.concatenate %35, %65, %95, %125, %155, %185, %215, %245 in 1 : vector<96x128xf32>, vector<96x128xf32>, vector<96x128xf32>, vector<96x128xf32>, vector<96x128xf32>, vector<96x128xf32>, vector<96x128xf32>, vector<96x128xf32> -> vector<96x1024xf32>
    %cst_25 = arith.constant dense<0.000000e+00> : vector<16x1024xf32>
    %247 = tpu.matmul %0, %246, %cst_25 {dimension_numbers = #tpu.dot_dimension_numbers<[1], [0], [0], [1], [0, 0, 1, 1], [], []>} : vector<16x96xf32>, vector<96x1024xf32>, vector<16x1024xf32> -> vector<16x1024xf32>
    %248 = vector.broadcast %1 : vector<16x1xf32> to vector<16x1024xf32>
    %249 = arith.addf %247, %248 : vector<16x1024xf32>
    %cst_26 = arith.constant 0.000000e+00 : f32
    %250 = vector.broadcast %cst_26 : f32 to vector<16x1024xf32>
    %251 = arith.maximumf %249, %250 : vector<16x1024xf32>
    %252 = vector.extract_strided_slice %251 {offsets = [0, 0], sizes = [16, 124], strides = [1, 1]} : vector<16x1024xf32> to vector<16x124xf32>
    %cst_27 = arith.constant dense<0xFF800000> : vector<16xf32>
    %253 = vector.multi_reduction <maximumf>, %252, %cst_27 [1] : vector<16x124xf32> to vector<16xf32>
    %254 = vector.shape_cast %253 : vector<16xf32> to vector<16x1xf32>
    %255 = vector.extract_strided_slice %251 {offsets = [0, 128], sizes = [16, 124], strides = [1, 1]} : vector<16x1024xf32> to vector<16x124xf32>
    %cst_28 = arith.constant dense<0xFF800000> : vector<16xf32>
    %256 = vector.multi_reduction <maximumf>, %255, %cst_28 [1] : vector<16x124xf32> to vector<16xf32>
    %257 = vector.shape_cast %256 : vector<16xf32> to vector<16x1xf32>
    %258 = vector.extract_strided_slice %251 {offsets = [0, 256], sizes = [16, 124], strides = [1, 1]} : vector<16x1024xf32> to vector<16x124xf32>
    %cst_29 = arith.constant dense<0xFF800000> : vector<16xf32>
    %259 = vector.multi_reduction <maximumf>, %258, %cst_29 [1] : vector<16x124xf32> to vector<16xf32>
    %260 = vector.shape_cast %259 : vector<16xf32> to vector<16x1xf32>
    %261 = vector.extract_strided_slice %251 {offsets = [0, 384], sizes = [16, 124], strides = [1, 1]} : vector<16x1024xf32> to vector<16x124xf32>
    %cst_30 = arith.constant dense<0xFF800000> : vector<16xf32>
    %262 = vector.multi_reduction <maximumf>, %261, %cst_30 [1] : vector<16x124xf32> to vector<16xf32>
    %263 = vector.shape_cast %262 : vector<16xf32> to vector<16x1xf32>
    %264 = vector.extract_strided_slice %251 {offsets = [0, 512], sizes = [16, 124], strides = [1, 1]} : vector<16x1024xf32> to vector<16x124xf32>
    %cst_31 = arith.constant dense<0xFF800000> : vector<16xf32>
    %265 = vector.multi_reduction <maximumf>, %264, %cst_31 [1] : vector<16x124xf32> to vector<16xf32>
    %266 = vector.shape_cast %265 : vector<16xf32> to vector<16x1xf32>
    %267 = vector.extract_strided_slice %251 {offsets = [0, 640], sizes = [16, 124], strides = [1, 1]} : vector<16x1024xf32> to vector<16x124xf32>
    %cst_32 = arith.constant dense<0xFF800000> : vector<16xf32>
    %268 = vector.multi_reduction <maximumf>, %267, %cst_32 [1] : vector<16x124xf32> to vector<16xf32>
    %269 = vector.shape_cast %268 : vector<16xf32> to vector<16x1xf32>
    %270 = vector.extract_strided_slice %251 {offsets = [0, 768], sizes = [16, 124], strides = [1, 1]} : vector<16x1024xf32> to vector<16x124xf32>
    %cst_33 = arith.constant dense<0xFF800000> : vector<16xf32>
    %271 = vector.multi_reduction <maximumf>, %270, %cst_33 [1] : vector<16x124xf32> to vector<16xf32>
    %272 = vector.shape_cast %271 : vector<16xf32> to vector<16x1xf32>
    %273 = vector.extract_strided_slice %251 {offsets = [0, 896], sizes = [16, 124], strides = [1, 1]} : vector<16x1024xf32> to vector<16x124xf32>
    %cst_34 = arith.constant dense<0xFF800000> : vector<16xf32>
    %274 = vector.multi_reduction <maximumf>, %273, %cst_34 [1] : vector<16x124xf32> to vector<16xf32>
    %275 = vector.shape_cast %274 : vector<16xf32> to vector<16x1xf32>
    %276 = tpu.concatenate %254, %257, %260, %263, %266, %269, %272, %275 in 1 : vector<16x1xf32>, vector<16x1xf32>, vector<16x1xf32>, vector<16x1xf32>, vector<16x1xf32>, vector<16x1xf32>, vector<16x1xf32>, vector<16x1xf32> -> vector<16x8xf32>
    %cst_35 = arith.constant dense<0.000000e+00> : vector<1x8xf32>
    %277 = tpu.matmul %2, %276, %cst_35 {dimension_numbers = #tpu.dot_dimension_numbers<[1], [0], [0], [1], [0, 0, 1, 1], [], []>} : vector<1x16xf32>, vector<16x8xf32>, vector<1x8xf32> -> vector<1x8xf32>
    %278 = vector.broadcast %3 : vector<1x1xf32> to vector<1x8xf32>
    %279 = arith.addf %277, %278 : vector<1x8xf32>
    %cst_36 = arith.constant 0.000000e+00 : f32
    %280 = vector.broadcast %cst_36 : f32 to vector<1x8xf32>
    %281 = arith.subf %280, %279 : vector<1x8xf32>
    %282 = math.exp %281 : vector<1x8xf32>
    %cst_37 = arith.constant 1.000000e+00 : f32
    %283 = vector.broadcast %cst_37 : f32 to vector<1x8xf32>
    %284 = arith.addf %283, %282 : vector<1x8xf32>
    %cst_38 = arith.constant 1.000000e+00 : f32
    %285 = vector.broadcast %cst_38 : f32 to vector<1x8xf32>
    %286 = arith.divf %285, %284 : vector<1x8xf32>
    %287 = vector.shape_cast %286 : vector<1x8xf32> to vector<1x1x8xf32>
    %c0_39 = arith.constant 0 : index
    %c0_40 = arith.constant 0 : index
    %c0_41 = arith.constant 0 : index
    %288 = vector.load %arg6[%c0_39, %c0_40, %c0_41] : memref<1x1x8xf32, #tpu.memory_space<vmem>>, vector<1x1x8xf32>
    tpu.vector_store %arg6[%c0_39, %c0_40, %c0_41], %287 {strides = array<i32>} : memref<1x1x8xf32, #tpu.memory_space<vmem>>, vector<1x1x8xf32>,
    return
  }
  func.func @transform_0(%arg0: i32) -> (i32, i32, i32) {
    %c0_i32 = arith.constant 0 : i32
    %c0_i32_0 = arith.constant 0 : i32
    %c0_i32_1 = arith.constant 0 : i32
    return %arg0, %c0_i32, %c0_i32_0 : i32, i32, i32
  }
  func.func @transform_1(%arg0: i32) -> (i32, i32) {
    %c0_i32 = arith.constant 0 : i32
    %c0_i32_0 = arith.constant 0 : i32
    %c0_i32_1 = arith.constant 0 : i32
    return %c0_i32, %c0_i32_0 : i32, i32
  }
  func.func @transform_2(%arg0: i32) -> (i32, i32) {
    %c0_i32 = arith.constant 0 : i32
    %c0_i32_0 = arith.constant 0 : i32
    %c0_i32_1 = arith.constant 0 : i32
    return %c0_i32, %c0_i32_0 : i32, i32
  }
  func.func @transform_3(%arg0: i32) -> (i32, i32) {
    %c0_i32 = arith.constant 0 : i32
    %c0_i32_0 = arith.constant 0 : i32
    %c0_i32_1 = arith.constant 0 : i32
    return %c0_i32, %c0_i32_0 : i32, i32
  }
  func.func @transform_4(%arg0: i32) -> (i32, i32) {
    %c0_i32 = arith.constant 0 : i32
    %c0_i32_0 = arith.constant 0 : i32
    %c0_i32_1 = arith.constant 0 : i32
    return %c0_i32, %c0_i32_0 : i32, i32
  }
  func.func @transform_5(%arg0: i32) -> (i32, i32, i32) {
    %c0_i32 = arith.constant 0 : i32
    %c0_i32_0 = arith.constant 0 : i32
    %c0_i32_1 = arith.constant 0 : i32
    return %arg0, %c0_i32, %c0_i32_0 : i32, i32, i32
  }
}

</mosaic_0001>

<bundles_post_ra>
// kernel: tpu_custom_call.1
= control target key start
LH: loop header
LB: loop body
LE: loop exit
PB: predicated region body
PF: predicated region fallthrough
CT: control target
= control target key end

     0   :  { %s3206_s0 = inlined_call_operand.hbm [shape: f32[8,4,101], index: 0, kind: input, shape index: {}]   ;;  %s3207_s1 = inlined_call_operand.vmem [shape: f32[16,96], index: 1, kind: input, shape index: {}]   ;;  %s3208_s2 = inlined_call_operand.vmem [shape: f32[16,1], index: 2, kind: input, shape index: {}]   ;;  %s3209_s3 = inlined_call_operand.vmem [shape: f32[1,16], index: 3, kind: input, shape index: {}]   ;;  %s3210_s4 = inlined_call_operand.<no memory space> [shape: f32[1,1], index: 4, kind: input, shape index: {}]   ;;  %s3211_s5 = inlined_call_operand.hbm [shape: f32[1,1,8], index: 5, kind: output, shape index: {}]  }
   0x1   :  { %v10_v0 = vstv %s3210_s4 }
   0x2   :  { %11 = vst [vmem:[#allocation2] sm:$0x1] %v10_v0 }
   0x3   :  { %12 = vsyncpa [#allocation4], 0 }
   0x4   :  { %13 = vsyncpa [#allocation5], 0  ;;  %s2023_s20 = smov [#allocation3]   ;;  %s1975_s24 = scalar_lea.hbm %s3206_s0, 512 }
   0x5   :  { %s19_s21 = sshll.u32 %s2023_s20, 4  ;;  %p1976_p0 = scmp.ne.s32.totalorder %s3206_s0, %s1975_s24  ;;  %s20_s21 = int_to_ptr.vmem [resolvable:$true] %s19_s21 }
   0x6   :  { %p1979_p1 = scmp.lt.u32.totalorder %s1975_s24, %s3206_s0 }
   0x8   :  { %p1981_p2 = pnand %p1979_p1, %p1976_p0 }
   0xa   :  { %1984 = shalt.err (!%p1981_p2)
}
   0xb   :  { %s1985_s4 = scalar_lea.vmem %s20_s21, 512  ;;  %p1990_p4 = scmp.lt.s32.totalorder %s20_s21, %s20_s21 }
   0xc   :  { %p1986_p3 = scmp.ne.s32.totalorder %s20_s21, %s1985_s4  ;;  %p1991_p5 = scmp.lt.s32.totalorder %s1985_s4, %s1985_s4 }
   0xe   :  { %p1992_p6 = por %p1991_p5, %p1990_p4 }
  0x10   :  { %p1993_p7 = pnand %p1992_p6, %p1986_p3 }
  0x12   :  { %1996 = shalt.err (!%p1993_p7)
}
  0x13   :  { %s2024_s29 = smov 64   ;;  %s2025_s30 = smov 4  }
  0x14   :  { %25 = dma.hbm_to_vmem [thread:$0]  %s3206_s0, 512, %s20_s21, [#allocation4], %s2024_s29, %s2024_s29, %s2025_s30  }
  0x15   :  { %2019 = dma.done.wait [#allocation4], 512  }
  0x16   :  { %2020 = vsyncadd [#allocation4], 4294966784  ;;  %v508_v1 = vld [vmem:[#allocation3 + $0x10] sm:$0xf]  ;;  %v606_v2 = vld [vmem:[#allocation3 + $0x14] sm:$0xf] }
  0x17   :  { %v43_v3 = vld [vmem:[#allocation3] sm:$0xf]  ;;  %v1569_v4 = vpack.i.bf16 %v508_v1, %v606_v2  ;;  %v214_v5 = vld [vmem:[#allocation3 + $0x4] sm:$0xf]  ;;  %v704_v6 = vld [vmem:[#allocation3 + $0x18] sm:$0xf] }
  0x18   :  { %v802_v7 = vld [vmem:[#allocation3 + $0x1c] sm:$0xf]  ;;  %v1559_v8 = vpack.i.bf16 %v43_v3, %v214_v5  ;;  %v312_v9 = vld [vmem:[#allocation3 + $0x8] sm:$0xf]  ;;  %v410_v10 = vld [vmem:[#allocation3 + $0xc] sm:$0xf] }
  0x19   :  { %s2026_s8 = smov 23   ;;  %v1574_v11 = vpack.i.bf16 %v704_v6, %v802_v7  ;;  %v1564_v12 = vpack.i.bf16 %v312_v9, %v410_v10  ;;  %vm48_vm0 = vcmask 187392   ;;  %vm50_vm1 = vcmask 1014784   ;;  %s2028_s0 = smov 126  }
  0x1a   :  { %1570 = vrot.lane.b32.xlu1 %v1569_v4, %s2026_s8  ;;  %1560 = vrot.lane.b32.xlu0 %v1559_v8, %s2026_s8  ;;  %v2027_v28 = vmov 0.25   ;;  %s2029_s9 = smov 124   ;;  %s2030_s10 = smov 122   ;;  %vm67_vm2 = vcmask 1031168   ;;  %vm60_vm3 = vcmask 1039360   ;;  %vm160_vm4 = vcmask 1043456  }
  0x1b   :  { %v55_v43 = vrot.slane %v2027_v28, 4  ;;  %s2031_s11 = smov 127   ;;  %s2032_s12 = smov 125   ;;  %vm74_vm5 = vcmask 1022976   ;;  %vm94_vm6 = vcmask 998400   ;;  %vm87_vm7 = vcmask 1006592  }
  0x1c   :  { %s2033_s13 = smov 123   ;;  %s2034_s14 = smov 121   ;;  %vm101_vm8 = vcmask 990208   ;;  %vm108_vm9 = vcmask 982016   ;;  %vm122_vm10 = vcmask 965632   ;;  %vm115_vm11 = vcmask 973824  }
  0x1d   :  { %s2035_s15 = smov 120   ;;  %s2036_s16 = smov 118   ;;  %vm129_vm12 = vcmask 957440   ;;  %vm143_vm13 = vcmask 941056   ;;  %vm136_vm14 = vcmask 949248   ;;  %vm150_vm15 = vcmask 932864  }
  0x1e   :  { %1575 = vrot.lane.b32.xlu1 %v1574_v11, %s2026_s8  ;;  %1565 = vrot.lane.b32.xlu0 %v1564_v12, %s2026_s8  ;;  %s2037_s17 = smov 116   ;;  %s2038_s18 = smov 119  }
  0x1f   :  { %s2039_s19 = smov 114   ;;  %s2040_s20 = smov 117  }
  0x20   :  { %s2041_s21 = smov 115   ;;  %s2042_s22 = smov 113  }
  0x21   :  { %s2043_s23 = smov 112   ;;  %s2048_s6 = smov [#allocation6]  }
  0x22   :  { %s1406_s7 = sshll.u32 %s2048_s6, 4  ;;  %s1407_s7 = int_to_ptr.vmem [resolvable:$true] %s1406_s7 }
  0x23   :  { %s2001_s8 = scalar_lea.vmem %s1407_s7, 32  ;;  %p2002_p9 = scmp.lt.s32.totalorder %s1407_s7, %s1407_s7 }
  0x8c   :  { %v1571_v13 = vpop.permute.xlu1 %1570  ;;  %v1561_v15 = vpop.permute.xlu0 %1560 }
  0x8d   :  { %v1572_v14 = vunpack.i.l.bf16 %v1571_v13  ;;  %v1562_v16 = vunpack.i.l.bf16 %v1561_v15  ;;  %v1563_v17 = vunpack.i.h.bf16 %v1561_v15  ;;  %v1573_v20 = vunpack.i.h.bf16 %v1571_v13 }
  0x8f   :  { %v219_v18 = vsel %vm48_vm0, 0.25, %v1562_v16  ;;  %v611_v21 = vsel %vm48_vm0, 0.25, %v1572_v14  ;;  %v49_v25 = vsel %vm48_vm0, 0.25, %v1563_v17  ;;  %v513_v31 = vsel %vm48_vm0, 0.25, %v1573_v20 }
  0x90   :  { %v1576_v19 = vpop.permute.xlu1 %1575  ;;  %v2097_v22 = vsel %vm50_vm1, %v219_v18, 0.25  ;;  %v1566_v23 = vpop.permute.xlu0 %1565  ;;  %v2104_v30 = vsel %vm50_vm1, %v611_v21, 0.25  ;;  %v2113_v35 = vsel %vm50_vm1, %v49_v25, 0.25  ;;  %v2130_v40 = vsel %vm50_vm1, %v513_v31, 0.25 }
  0x91   :  { %v1577_v24 = vunpack.i.l.bf16 %v1576_v19  ;;  %v1568_v26 = vunpack.i.h.bf16 %v1566_v23  ;;  %v1567_v27 = vunpack.i.l.bf16 %v1566_v23  ;;  %v2101_v29 = vpack.i.bf16 %v2097_v22, %v2027_v28 }
  0x92   :  { %v222_v42 = vrot.slane %v2097_v22, 4  ;;  %v614_v45 = vrot.slane %v2104_v30, 4  ;;  %v516_v50 = vrot.slane %v2130_v40, 4  ;;  %v54_v51 = vrot.slane %v2113_v35, 4 }
  0x93   :  { %v807_v32 = vsel %vm48_vm0, 0.25, %v1577_v24  ;;  %v317_v33 = vsel %vm48_vm0, 0.25, %v1568_v26  ;;  %v415_v34 = vsel %vm48_vm0, 0.25, %v1567_v27  ;;  %1580 = vrot.lane.b32.xlu1 %v2101_v29, %s2028_s0  ;;  %v1578_v55 = vunpack.i.h.bf16 %v1576_v19 }
  0x94   :  { %v2116_v36 = vsel %vm50_vm1, %v317_v33, 0.25  ;;  %v2119_v37 = vsel %vm50_vm1, %v415_v34, 0.25  ;;  %v2133_v41 = vsel %vm50_vm1, %v807_v32, 0.25  ;;  %v2150_v47 = vpack.i.bf16 %v222_v42, %v55_v43 }
  0x95   :  { %v2123_v38 = vpack.i.bf16 %v2119_v37, %v2113_v35  ;;  %v2127_v39 = vpack.i.bf16 %v2104_v30, %v2116_v36  ;;  %v2142_v44 = vpack.i.bf16 %v2133_v41, %v2130_v40  ;;  %v320_v46 = vrot.slane %v2116_v36, 4 }
  0x96   :  { %v418_v48 = vrot.slane %v2119_v37, 4  ;;  %v810_v52 = vrot.slane %v2133_v41, 4  ;;  %v709_v56 = vsel %vm48_vm0, 0.25, %v1578_v55  ;;  %vm157_vm0 = vcmask 924672  }
  0x97   :  { %1585 = vrot.lane.b32.xlu0 %v2123_v38, %s2028_s0  ;;  %1590 = vrot.lane.b32.xlu1 %v2127_v39, %s2028_s0  ;;  %v2153_v49 = vpack.i.bf16 %v614_v45, %v320_v46  ;;  %v2180_v57 = vsel %vm50_vm1, %v709_v56, 0.25 }
  0x98   :  { %v2161_v53 = vpack.i.bf16 %v418_v48, %v54_v51  ;;  %v2167_v54 = vpack.i.bf16 %v810_v52, %v516_v50  ;;  %v2196_v58 = vrot.slane %v2180_v57, 4 }
  0x9b   :  { %1625 = vrot.lane.b32.xlu0 %v2142_v44, %s2028_s0  ;;  %1595 = vrot.lane.b32.xlu1 %v2101_v29, %s2029_s9 }
  0x9f   :  { %1600 = vrot.lane.b32.xlu1 %v2101_v29, %s2030_s10  ;;  %1680 = vrot.lane.b32.xlu0 %v2150_v47, %s2031_s11 }
  0xa3   :  { %1605 = vrot.lane.b32.xlu1 %v2123_v38, %s2029_s9  ;;  %1685 = vrot.lane.b32.xlu0 %v2150_v47, %s2032_s12 }
  0xa7   :  { %1610 = vrot.lane.b32.xlu1 %v2123_v38, %s2030_s10  ;;  %1720 = vrot.lane.b32.xlu0 %v2153_v49, %s2031_s11 }
  0xab   :  { %1615 = vrot.lane.b32.xlu1 %v2127_v39, %s2029_s9  ;;  %1725 = vrot.lane.b32.xlu0 %v2153_v49, %s2032_s12 }
  0xaf   :  { %1620 = vrot.lane.b32.xlu1 %v2127_v39, %s2030_s10  ;;  %1730 = vrot.lane.b32.xlu0 %v2150_v47, %s2033_s13 }
  0xb3   :  { %717 = vrot.lane.b32.xlu1 %v2180_v57, %s2028_s0  ;;  %1735 = vrot.lane.b32.xlu0 %v2150_v47, %s2034_s14 }
  0xb7   :  { %1630 = vrot.lane.b32.xlu1 %v2142_v44, %s2029_s9  ;;  %1740 = vrot.lane.b32.xlu0 %v2161_v53, %s2033_s13 }
  0xbb   :  { %1635 = vrot.lane.b32.xlu1 %v2142_v44, %s2030_s10  ;;  %1745 = vrot.lane.b32.xlu0 %v2161_v53, %s2034_s14 }
  0xbf   :  { %725 = vrot.lane.b32.xlu1 %v2180_v57, %s2029_s9  ;;  %1750 = vrot.lane.b32.xlu0 %v2153_v49, %s2033_s13 }
  0xc3   :  { %733 = vrot.lane.b32.xlu1 %v2180_v57, %s2030_s10  ;;  %1755 = vrot.lane.b32.xlu0 %v2153_v49, %s2034_s14 }
  0xc7   :  { %1640 = vrot.lane.b32.xlu1 %v2101_v29, %s2035_s15  ;;  %713 = vrot.lane.b32.xlu0 %v2196_v58, %s2031_s11 }
  0xcb   :  { %1645 = vrot.lane.b32.xlu1 %v2101_v29, %s2036_s16  ;;  %721 = vrot.lane.b32.xlu0 %v2196_v58, %s2032_s12 }
  0xcf   :  { %1650 = vrot.lane.b32.xlu1 %v2123_v38, %s2035_s15  ;;  %1775 = vrot.lane.b32.xlu0 %v2167_v54, %s2033_s13 }
  0xd3   :  { %1655 = vrot.lane.b32.xlu1 %v2123_v38, %s2036_s16  ;;  %1780 = vrot.lane.b32.xlu0 %v2167_v54, %s2034_s14 }
  0xd7   :  { %1660 = vrot.lane.b32.xlu1 %v2127_v39, %s2035_s15  ;;  %729 = vrot.lane.b32.xlu0 %v2196_v58, %s2033_s13 }
  0xdb   :  { %1665 = vrot.lane.b32.xlu1 %v2127_v39, %s2036_s16  ;;  %737 = vrot.lane.b32.xlu0 %v2196_v58, %s2034_s14 }
  0xdf   :  { %1670 = vrot.lane.b32.xlu1 %v2101_v29, %s2037_s17  ;;  %1785 = vrot.lane.b32.xlu0 %v2150_v47, %s2038_s18 }
  0xe3   :  { %1675 = vrot.lane.b32.xlu1 %v2101_v29, %s2039_s19  ;;  %1790 = vrot.lane.b32.xlu0 %v2150_v47, %s2040_s20 }
  0xe7   :  { %1690 = vrot.lane.b32.xlu1 %v2161_v53, %s2031_s11  ;;  %1795 = vrot.lane.b32.xlu0 %v2161_v53, %s2038_s18 }
  0xeb   :  { %1695 = vrot.lane.b32.xlu1 %v2161_v53, %s2032_s12  ;;  %1800 = vrot.lane.b32.xlu0 %v2161_v53, %s2040_s20 }
  0xef   :  { %1700 = vrot.lane.b32.xlu1 %v2123_v38, %s2037_s17  ;;  %1805 = vrot.lane.b32.xlu0 %v2153_v49, %s2038_s18 }
  0xf3   :  { %1705 = vrot.lane.b32.xlu1 %v2123_v38, %s2039_s19  ;;  %1810 = vrot.lane.b32.xlu0 %v2153_v49, %s2040_s20 }
  0xf7   :  { %1710 = vrot.lane.b32.xlu1 %v2127_v39, %s2037_s17  ;;  %1815 = vrot.lane.b32.xlu0 %v2150_v47, %s2041_s21 }
  0xfb   :  { %1715 = vrot.lane.b32.xlu1 %v2127_v39, %s2039_s19  ;;  %1820 = vrot.lane.b32.xlu0 %v2150_v47, %s2042_s22 }
  0xff   :  { %1760 = vrot.lane.b32.xlu1 %v2167_v54, %s2031_s11  ;;  %1825 = vrot.lane.b32.xlu0 %v2161_v53, %s2041_s21 }
 0x103   :  { %1765 = vrot.lane.b32.xlu1 %v2167_v54, %s2032_s12  ;;  %1830 = vrot.lane.b32.xlu0 %v2161_v53, %s2042_s22 }
 0x105   :  { %v1581_v59 = vpop.permute.xlu1 %1580 }
 0x106   :  { %v2260_v60 = vunpack.i.l.bf16 %v1581_v59  ;;  %v1583_v17 = vunpack.i.h.bf16 %v1581_v59 }
 0x107   :  { %1835 = vrot.lane.b32.xlu0 %v2153_v49, %s2041_s21 }
 0x108   :  { %v229_v26 = vsel %vm67_vm2, %v1583_v17, %v2260_v60 }
 0x109   :  { %v1586_v61 = vpop.permute.xlu0 %1585  ;;  %v1591_v62 = vpop.permute.xlu1 %1590 }
 0x10a   :  { %v1588_v63 = vunpack.i.h.bf16 %v1586_v61  ;;  %v1587_v0 = vunpack.i.l.bf16 %v1586_v61  ;;  %v1593_v1 = vunpack.i.h.bf16 %v1591_v62  ;;  %v1592_v2 = vunpack.i.l.bf16 %v1591_v62 }
 0x10b   :  { %1840 = vrot.lane.b32.xlu0 %v2153_v49, %s2042_s22 }
 0x10c   :  { %v2266_v3 = vsel %vm67_vm2, %v1588_v63, %v2260_v60  ;;  %v2270_v4 = vsel %vm67_vm2, %v1587_v0, %v2260_v60  ;;  %v2274_v5 = vsel %vm67_vm2, %v1592_v2, %v2260_v60  ;;  %v621_v6 = vsel %vm67_vm2, %v1593_v1, %v2260_v60 }
 0x10d   :  { %v1626_v7 = vpop.permute.xlu0 %1625  ;;  %v2278_v8 = vpop.permute.xlu1 %1595 }
 0x10e   :  { %v1628_v9 = vunpack.i.h.bf16 %v1626_v7  ;;  %v1627_v10 = vunpack.i.l.bf16 %v1626_v7 }
 0x110   :  { %v2282_v11 = vsel %vm67_vm2, %v1627_v10, %v2260_v60  ;;  %v2286_v12 = vsel %vm67_vm2, %v1628_v9, %v2260_v60 }
 0x111   :  { %v2288_v13 = vpop.permute.xlu1 %1600  ;;  %v1681_v14 = vpop.permute.xlu0 %1680 }
 0x112   :  { %v1683_v15 = vunpack.i.h.bf16 %v1681_v14  ;;  %v2290_v16 = vunpack.i.l.bf16 %v1681_v14  ;;  %v2337_v49 = vunpack.i.l.bf16 %v2288_v13 }
 0x114   :  { %v225_v23 = vsel %vm60_vm3, %v1683_v15, %v2290_v16  ;;  %v176_v24 = vsel %vm160_vm4, 0.25, %v2290_v16 }
 0x115   :  { %v2292_v18 = vpop.permute.xlu1 %1605  ;;  %v1686_v19 = vpop.permute.xlu0 %1685  ;;  %v2316_v33 = vsel %vm160_vm4, %v2097_v22, %v225_v23 }
 0x116   :  { %v1688_v20 = vunpack.i.h.bf16 %v1686_v19  ;;  %v2294_v21 = vunpack.i.l.bf16 %v1686_v19 }
 0x118   :  { %v177_v25 = vsel %vm160_vm4, %v2260_v60, %v2294_v21  ;;  %v233_v27 = vsel %vm74_vm5, %v1688_v20, %v2294_v21 }
 0x119   :  { %v2307_v28 = vpop.permute.xlu1 %1610  ;;  %v2309_v29 = vpop.permute.xlu0 %1720  ;;  %v1769_v31 = vpack.i.bf16 %v177_v25, %v176_v24  ;;  %v2312_v32 = vsel %vm160_vm4, %v229_v26, %v233_v27 }
 0x11a   :  { %v1723_v34 = vunpack.i.h.bf16 %v2309_v29  ;;  %v1434_v38 = vpack.c.bf16 %v2312_v32, %v2316_v33 }
 0x11b   :  { %1770 = vrot.lane.b32.xlu1 %v1769_v31, %s2043_s23 }
 0x11c   :  { %1435 = vmatprep.subr.bf16.mxu0 %v1434_v38  ;;  %v617_v22 = vsel %vm60_vm3, %v1723_v34, %v2290_v16 }
 0x11d   :  { %v1616_v39 = vpop.permute.xlu1 %1615  ;;  %v2322_v42 = vpop.permute.xlu0 %1725  ;;  %v2341_v52 = vsel %vm160_vm4, %v2104_v30, %v617_v22  ;;  %v2357_v30 = vunpack.i.l.bf16 %v2278_v8 }
 0x11e   :  { %v1728_v43 = vunpack.i.h.bf16 %v2322_v42  ;;  %v1618_v24 = vunpack.i.h.bf16 %v1616_v39  ;;  %v1617_v25 = vunpack.i.l.bf16 %v1616_v39 }
 0x11f   :  { %1850 = vrot.lane.b32.xlu1 %v2142_v44, %s2035_s15 }
 0x120   :  { %v625_v45 = vsel %vm74_vm5, %v1728_v43, %v2294_v21 }
 0x121   :  { %v1621_v46 = vpop.permute.xlu1 %1620  ;;  %v2331_v47 = vpop.permute.xlu0 %1730  ;;  %v2334_v48 = vsel %vm160_vm4, %v621_v6, %v625_v45 }
 0x122   :  { %v1623_v50 = vunpack.i.h.bf16 %v1621_v46  ;;  %v1622_v51 = vunpack.i.l.bf16 %v1621_v46  ;;  %v2352_v59 = vunpack.i.l.bf16 %v2331_v47  ;;  %v335_v46 = vsel %vm50_vm1, %v1617_v25, %v2357_v30 }
 0x123   :  { %1860 = vrot.lane.b32.xlu1 %v2142_v44, %s2036_s16 }
 0x124   :  { %v343_v55 = vsel %vm94_vm6, %v1622_v51, %v2337_v49  ;;  %v637_v56 = vsel %vm94_vm6, %v1623_v50, %v2337_v49  ;;  %v178_v1 = vsel %vm160_vm4, %v2357_v30, %v2352_v59  ;;  %v629_v50 = vsel %vm50_vm1, %v1618_v24, %v2357_v30 }
 0x125   :  { %v718_v61 = vpop.permute.xlu1 %717  ;;  %v2354_v62 = vpop.permute.xlu0 %1735 }
 0x126   :  { %v719_v63 = vsel %vm67_vm2, %v718_v61, %v2260_v60  ;;  %v2362_v0 = vunpack.i.l.bf16 %v2354_v62  ;;  %vm204_vm2 = vcmask 916480  }
 0x127   :  { %741 = vrot.lane.b32.xlu1 %v2180_v57, %s2035_s15 }
 0x128   :  { %v179_v2 = vsel %vm160_vm4, %v2337_v49, %v2362_v0 }
 0x129   :  { %v1631_v6 = vpop.permute.xlu1 %1630  ;;  %v2372_v7 = vpop.permute.xlu0 %1740  ;;  %v1844_v9 = vpack.i.bf16 %v179_v2, %v178_v1 }
 0x12a   :  { %v1633_v10 = vunpack.i.h.bf16 %v1631_v6  ;;  %v1632_v60 = vunpack.i.l.bf16 %v1631_v6 }
 0x12b   :  { %1845 = vrot.lane.b32.xlu0 %v1844_v9, %s2043_s23  ;;  %749 = vrot.lane.b32.xlu1 %v2180_v57, %s2036_s16 }
 0x12c   :  { %v2379_v14 = vsel %vm50_vm1, %v1632_v60, %v2357_v30  ;;  %v2383_v15 = vsel %vm50_vm1, %v1633_v10, %v2357_v30 }
 0x12d   :  { %v1636_v17 = vpop.permute.xlu1 %1635  ;;  %v2385_v19 = vpop.permute.xlu0 %1745 }
 0x12e   :  { %v1638_v20 = vunpack.i.h.bf16 %v1636_v17  ;;  %v1637_v23 = vunpack.i.l.bf16 %v1636_v17  ;;  %v1748_v53 = vunpack.i.h.bf16 %v2385_v19 }
 0x12f   :  { %1855 = vrot.lane.b32.xlu0 %v2167_v54, %s2038_s18  ;;  %1870 = vrot.lane.b32.xlu1 %v2142_v44, %s2037_s17 }
 0x130   :  { %v2393_v26 = vsel %vm94_vm6, %v1637_v23, %v2337_v49  ;;  %v2397_v27 = vsel %vm94_vm6, %v1638_v20, %v2337_v49 }
 0x131   :  { %v726_v31 = vpop.permute.xlu1 %725  ;;  %v1751_v34 = vpop.permute.xlu0 %1750 }
 0x132   :  { %v2401_v38 = vsel %vm50_vm1, %v726_v31, %v2357_v30  ;;  %v1753_v43 = vunpack.i.h.bf16 %v1751_v34  ;;  %v1752_v22 = vunpack.i.l.bf16 %v1751_v34  ;;  %v1612_v34 = vunpack.i.l.bf16 %v2307_v28 }
 0x133   :  { %1865 = vrot.lane.b32.xlu0 %v2167_v54, %s2040_s20  ;;  %1880 = vrot.lane.b32.xlu1 %v2142_v44, %s2039_s19 }
 0x134   :  { %v339_v39 = vsel %vm87_vm7, %v1752_v22, %v2352_v59  ;;  %v633_v45 = vsel %vm87_vm7, %v1753_v43, %v2352_v59 }
 0x135   :  { %v734_v51 = vpop.permute.xlu1 %733  ;;  %v1756_v61 = vpop.permute.xlu0 %1755  ;;  %v2416_v1 = vsel %vm160_vm4, %v335_v46, %v339_v39  ;;  %v2419_v2 = vsel %vm160_vm4, %v629_v50, %v633_v45 }
 0x136   :  { %3232 = vst [vmem:[#allocation9_spill] sm:$0xff] %v2419_v2  ;;  %v2423_v44 = vsel %vm94_vm6, %v734_v51, %v2337_v49  ;;  %v1758_v6 = vunpack.i.h.bf16 %v1756_v61  ;;  %v1757_v9 = vunpack.i.l.bf16 %v1756_v61 }
 0x137   :  { %745 = vrot.lane.b32.xlu0 %v2196_v58, %s2038_s18 }
 0x138   :  { %v347_v10 = vsel %vm101_vm8, %v1757_v9, %v2362_v0  ;;  %v641_v60 = vsel %vm101_vm8, %v1758_v6, %v2362_v0 }
 0x139   :  { %v2431_v17 = vpop.permute.xlu1 %1640  ;;  %v714_v20 = vpop.permute.xlu0 %713  ;;  %v2434_v23 = vsel %vm160_vm4, %v343_v55, %v347_v10  ;;  %v2437_v24 = vsel %vm160_vm4, %v637_v56, %v641_v60  ;;  %v1733_v55 = vunpack.i.h.bf16 %v2331_v47  ;;  %v1747_v47 = vunpack.i.l.bf16 %v2385_v19 }
 0x13a   :  { %3233 = vst [vmem:[#allocation10_spill] sm:$0xff] %v2437_v24  ;;  %v715_v43 = vsel %vm60_vm3, %v714_v20, %v2290_v16  ;;  %v1889_v20 = vpack.i.bf16 %v2312_v32, %v2316_v33  ;;  %v445_v19 = vsel %vm101_vm8, %v1748_v53, %v2362_v0 }
 0x13b   :  { %753 = vrot.lane.b32.xlu0 %v2196_v58, %s2040_s20  ;;  %v2457_v45 = vsel %vm160_vm4, %v2180_v57, %v715_v43 }
 0x13c   :  { %3234 = vst [vmem:[#allocation11_spill] sm:$0xff] %v2457_v45 }
 0x13d   :  { %v2451_v56 = vpop.permute.xlu1 %1645  ;;  %v722_v22 = vpop.permute.xlu0 %721 }
 0x13e   :  { %v723_v39 = vsel %vm74_vm5, %v722_v22, %v2294_v21 }
 0x13f   :  { %v2460_v46 = vsel %vm160_vm4, %v719_v63, %v723_v39  ;;  %1875 = vrot.lane.b32.xlu0 %v2167_v54, %s2041_s21 }
 0x141   :  { %v2468_v61 = vpop.permute.xlu1 %1650  ;;  %v1776_v6 = vpop.permute.xlu0 %1775 }
 0x142   :  { %v1778_v9 = vunpack.i.h.bf16 %v1776_v6  ;;  %v1777_v10 = vunpack.i.l.bf16 %v1776_v6 }
 0x143   :  { %1885 = vrot.lane.b32.xlu0 %v2167_v54, %s2042_s22 }
 0x144   :  { %v535_v63 = vsel %vm87_vm7, %v1777_v10, %v2352_v59  ;;  %v829_v60 = vsel %vm87_vm7, %v1778_v9, %v2352_v59 }
 0x145   :  { %v2478_v43 = vpop.permute.xlu1 %1655  ;;  %v1781_v22 = vpop.permute.xlu0 %1780  ;;  %v2482_v39 = vsel %vm160_vm4, %v2379_v14, %v535_v63  ;;  %v2486_v6 = vsel %vm160_vm4, %v2383_v15, %v829_v60  ;;  %v1727_v63 = vunpack.i.l.bf16 %v2322_v42  ;;  %v1738_v60 = vunpack.i.h.bf16 %v2354_v62 }
 0x146   :  { %3235 = vst [vmem:[#allocation12_spill] sm:$0xff] %v2482_v39  ;;  %3236 = vst [vmem:[#allocation13_spill] sm:$0xff] %v2486_v6  ;;  %v1783_v54 = vunpack.i.h.bf16 %v1781_v22  ;;  %v1782_v50 = vunpack.i.l.bf16 %v1781_v22  ;;  %v1598_v62 = vunpack.i.h.bf16 %v2278_v8  ;;  %v1743_v42 = vunpack.i.h.bf16 %v2372_v7 }
 0x147   :  { %1890 = vrot.lane.b32.xlu0 %v1889_v20, %s2043_s23 }
 0x148   :  { %v543_v9 = vsel %vm101_vm8, %v1782_v50, %v2362_v0  ;;  %v837_v32 = vsel %vm101_vm8, %v1783_v54, %v2362_v0  ;;  %v1603_v54 = vunpack.i.h.bf16 %v2288_v13  ;;  %v249_v13 = vsel %vm101_vm8, %v1738_v60, %v2362_v0 }
 0x149   :  { %v2493_v33 = vpop.permute.xlu1 %1660  ;;  %v730_v10 = vpop.permute.xlu0 %729  ;;  %v2497_v14 = vsel %vm160_vm4, %v2393_v26, %v543_v9  ;;  %v2501_v15 = vsel %vm160_vm4, %v2397_v27, %v837_v32  ;;  %v1608_v9 = vunpack.i.h.bf16 %v2292_v18  ;;  %v1607_v32 = vunpack.i.l.bf16 %v2292_v18 }
 0x14a   :  { %3237 = vst [vmem:[#allocation14_spill] sm:$0xff] %v2497_v14  ;;  %3238 = vst [vmem:[#allocation15_spill] sm:$0xff] %v2501_v15  ;;  %v731_v50 = vsel %vm87_vm7, %v730_v10, %v2352_v59  ;;  %v1613_v26 = vunpack.i.h.bf16 %v2307_v28  ;;  %v1742_v27 = vunpack.i.l.bf16 %v2372_v7  ;;  %v245_v28 = vsel %vm94_vm6, %v1603_v54, %v2337_v49 }
 0x14b   :  { %v2511_v22 = vsel %vm160_vm4, %v2401_v38, %v731_v50  ;;  %v1722_v38 = vunpack.i.l.bf16 %v2309_v29  ;;  %v331_v29 = vsel %vm74_vm5, %v1727_v63, %v2294_v21  ;;  %v237_v63 = vsel %vm50_vm1, %v1598_v62, %v2357_v30 }
 0x14c   :  { %3239 = vst [vmem:[#allocation16_spill] sm:$0xff] %v2511_v22  ;;  %v437_v60 = vsel %vm87_vm7, %v1743_v42, %v2352_v59  ;;  %v2568_v62 = vsel %vm160_vm4, %v245_v28, %v249_v13  ;;  %v81_v53 = vsel %vm50_vm1, %v1607_v32, %v2357_v30  ;;  %v102_v54 = vsel %vm101_vm8, %v1747_v47, %v2362_v0 }
 0x14d   :  { %v2524_v10 = vpop.permute.xlu1 %1665  ;;  %v738_v50 = vpop.permute.xlu0 %737  ;;  %v323_v7 = vsel %vm60_vm3, %v1722_v38, %v2290_v16  ;;  %v433_v38 = vsel %vm50_vm1, %v1608_v9, %v2357_v30  ;;  %v441_v42 = vsel %vm94_vm6, %v1613_v26, %v2337_v49  ;;  %v1643_v47 = vunpack.i.h.bf16 %v2431_v17 }
 0x14e   :  { %v739_v8 = vsel %vm101_vm8, %v738_v50, %v2362_v0  ;;  %v2563_v50 = vsel %vm160_vm4, %v2274_v5, %v331_v29  ;;  %v2580_v5 = vsel %vm160_vm4, %v2116_v36, %v323_v7  ;;  %v2592_v0 = vsel %vm160_vm4, %v441_v42, %v445_v19 }
 0x14f   :  { %v2536_v18 = vsel %vm160_vm4, %v2423_v44, %v739_v8  ;;  %v241_v8 = vsel %vm87_vm7, %v1733_v55, %v2352_v59  ;;  %v88_v55 = vsel %vm87_vm7, %v1742_v27, %v2352_v59  ;;  %v95_v36 = vsel %vm94_vm6, %v1612_v34, %v2337_v49 }
 0x150   :  { %3240 = vst [vmem:[#allocation17_spill] sm:$0xff] %v2536_v18  ;;  %v2587_v30 = vsel %vm160_vm4, %v237_v63, %v241_v8  ;;  %v2601_v32 = vsel %vm160_vm4, %v433_v38, %v437_v60  ;;  %v2607_v63 = vunpack.i.l.bf16 %v2431_v17  ;;  %v2610_v7 = vsel %vm160_vm4, %v81_v53, %v88_v55 }
 0x151   :  { %v2547_v20 = vpop.permute.xlu1 %1670  ;;  %v2549_v44 = vpop.permute.xlu0 %1785  ;;  %v2613_v49 = vsel %vm160_vm4, %v95_v36, %v102_v54  ;;  %v1648_v34 = vunpack.i.h.bf16 %v2451_v56  ;;  %v2617_v19 = vunpack.i.l.bf16 %v2451_v56  ;;  %v1652_v60 = vunpack.i.l.bf16 %v2468_v61 }
 0x152   :  { %3241 = vst [vmem:[#allocation18_spill] sm:$0xff] %v2607_v63  ;;  %v1653_v28 = vunpack.i.h.bf16 %v2468_v61  ;;  %v1658_v17 = vunpack.i.h.bf16 %v2478_v43  ;;  %v1657_v38 = vunpack.i.l.bf16 %v2478_v43  ;;  %v1662_v53 = vunpack.i.l.bf16 %v2493_v33 }
 0x153   :  { %v1663_v42 = vunpack.i.h.bf16 %v2493_v33  ;;  %v253_v61 = vsel %vm108_vm9, %v1643_v47, %v2607_v63  ;;  %v1788_v29 = vunpack.i.h.bf16 %v2549_v44  ;;  %v2637_v43 = vunpack.i.l.bf16 %v2549_v44 }
 0x154   :  { %v261_v25 = vsel %vm122_vm10, %v1648_v34, %v2617_v19  ;;  %v2643_v33 = vsel %vm108_vm9, %v1652_v60, %v2607_v63  ;;  %v2649_v51 = vsel %vm108_vm9, %v1653_v28, %v2607_v63  ;;  %v2653_v47 = vsel %vm122_vm10, %v1657_v38, %v2617_v19 }
 0x155   :  { %v2584_v13 = vpop.permute.xlu1 %1675  ;;  %v1791_v9 = vpop.permute.xlu0 %1790  ;;  %v457_v44 = vsel %vm122_vm10, %v1658_v17, %v2617_v19  ;;  %v2659_v34 = vsel %vm108_vm9, %v1662_v53, %v2607_v63  ;;  %v1668_v38 = vunpack.i.h.bf16 %v2524_v10  ;;  %v1667_v27 = vunpack.i.l.bf16 %v2524_v10 }
 0x156   :  { %v1793_v59 = vunpack.i.h.bf16 %v1791_v9  ;;  %v2645_v36 = vunpack.i.l.bf16 %v1791_v9  ;;  %v645_v9 = vsel %vm108_vm9, %v1663_v42, %v2607_v63  ;;  %v257_v17 = vsel %vm115_vm11, %v1788_v29, %v2637_v43 }
 0x157   :  { %v359_v45 = vsel %vm122_vm10, %v1667_v27, %v2617_v19  ;;  %v287_v27 = vsel %vm160_vm4, %v253_v61, %v257_v17  ;;  %v3242_v61 = vpack.c.bf16 %v2568_v62, %v2587_v30  ;;  %vm1294_vm6 = vcmask 23552  }
 0x158   :  { %v265_v6 = vsel %vm129_vm12, %v1793_v59, %v2645_v36  ;;  %vm1297_vm7 = vcmask 31744   ;;  %vm1300_vm8 = vcmask 39936  }
 0x159   :  { %v1691_v55 = vpop.permute.xlu1 %1690  ;;  %v2626_v54 = vpop.permute.xlu0 %1795 }
 0x15a   :  { %v1693_v56 = vunpack.i.h.bf16 %v1691_v55  ;;  %v1692_v31 = vunpack.i.l.bf16 %v1691_v55  ;;  %v1798_v63 = vunpack.i.h.bf16 %v2626_v54 }
 0x15c   :  { %v421_v28 = vsel %vm60_vm3, %v1693_v56, %v2290_v16  ;;  %v61_v53 = vsel %vm60_vm3, %v1692_v31, %v2290_v16 }
 0x15d   :  { %v1696_v60 = vpop.permute.xlu1 %1695  ;;  %v1801_v55 = vpop.permute.xlu0 %1800  ;;  %v479_v29 = vsel %vm160_vm4, %v2119_v37, %v421_v28  ;;  %v1797_v37 = vunpack.i.l.bf16 %v2626_v54  ;;  %v288_v54 = vsel %vm160_vm4, %v261_v25, %v265_v6  ;;  %v3243_v25 = vpack.c.bf16 %v2563_v50, %v2580_v5 }
 0x15e   :  { %v1698_v8 = vunpack.i.h.bf16 %v1696_v60  ;;  %v1697_v26 = vunpack.i.l.bf16 %v1696_v60  ;;  %v1803_v60 = vunpack.i.h.bf16 %v1801_v55  ;;  %v1802_v22 = vunpack.i.l.bf16 %v1801_v55 }
 0x15f   :  { %v653_v55 = vsel %vm122_vm10, %v1668_v38, %v2617_v19  ;;  %v1442_v17 = vpack.c.bf16 %v288_v54, %v287_v27  ;;  %v3250_v54 = vpack.i.bf16 %v2568_v62, %v2587_v30  ;;  %v1919_v62 = vpack.i.bf16 %v2592_v0, %v2601_v32 }
 0x160   :  { %v75_v42 = vsel %vm74_vm5, %v1697_v26, %v2294_v21  ;;  %v429_v56 = vsel %vm74_vm5, %v1698_v8, %v2294_v21  ;;  %v161_v8 = vsel %vm160_vm4, %v2113_v35, %v61_v53  ;;  %v453_v53 = vsel %vm115_vm11, %v1798_v63, %v2637_v43 }
 0x161   :  { %v2678_v15 = vpop.permute.xlu1 %1700  ;;  %v1806_v10 = vpop.permute.xlu0 %1805  ;;  %v480_v31 = vsel %vm160_vm4, %v2266_v3, %v429_v56  ;;  %v162_v59 = vsel %vm160_vm4, %v2270_v4, %v75_v42  ;;  %v461_v3 = vsel %vm129_vm12, %v1803_v60, %v2645_v36  ;;  %v130_v42 = vsel %vm129_vm12, %v1802_v22, %v2645_v36 }
 0x162   :  { %v1808_v26 = vunpack.i.h.bf16 %v1806_v10  ;;  %v1807_v18 = vunpack.i.l.bf16 %v1806_v10  ;;  %v1899_v2 = vpack.i.bf16 %v480_v31, %v479_v29  ;;  %v1458_v24 = vpack.c.bf16 %v480_v31, %v479_v29 }
 0x163   :  { %v1894_v39 = vpack.i.bf16 %v162_v59, %v161_v8  ;;  %v1436_v14 = vpack.c.bf16 %v162_v59, %v161_v8  ;;  %v484_v6 = vsel %vm160_vm4, %v457_v44, %v461_v3  ;;  %v3244_v63 = vpack.c.bf16 %v2592_v0, %v2601_v32 }
 0x164   :  { %v649_v4 = vsel %vm115_vm11, %v1808_v26, %v2637_v43  ;;  %1459 = vmatprep.subr.bf16.mxu1 %v1458_v24  ;;  %1900 = vrot.lane.b32.xlu0 %v1899_v2, %s2043_s23  ;;  %v1673_v2 = vunpack.i.h.bf16 %v2547_v20  ;;  %v355_v60 = vsel %vm115_vm11, %v1807_v18, %v2637_v43  ;;  %v3245_v44 = vpack.i.bf16 %v2613_v49, %v2610_v7 }
 0x165   :  { %v2698_v35 = vpop.permute.xlu1 %1705  ;;  %v1811_v28 = vpop.permute.xlu0 %1810  ;;  %1895 = vrot.lane.b32.xlu1 %v1894_v39, %s2043_s23  ;;  %1437 = vmatpush1.bf16.msra.mxu0 %v1436_v14  ;;  %v2718_v39 = vsel %vm160_vm4, %v645_v9, %v649_v4  ;;  %v116_v14 = vsel %vm115_vm11, %v1797_v37, %v2637_v43  ;;  %v483_v10 = vsel %vm160_vm4, %v2649_v51, %v453_v53  ;;  %v1678_v4 = vunpack.i.h.bf16 %v2584_v13 }
 0x166   :  { %v1813_v24 = vunpack.i.h.bf16 %v1811_v28  ;;  %v1812_v38 = vunpack.i.l.bf16 %v1811_v28  ;;  %1439 = vmatprep.subr.bf16.mxu0 %v3242_v61  ;;  %1461 = vmatpush1.bf16.msra.mxu1 %v3243_v25  ;;  %v166_v29 = vsel %vm160_vm4, %v2653_v47, %v130_v42  ;;  %v3246_v26 = vpack.i.bf16 %v2563_v50, %v2580_v5 }
 0x167   :  { %1463 = vmatprep.subr.bf16.mxu1 %v3244_v63  ;;  %v3247_v8 = vpack.c.bf16 %v2613_v49, %v2610_v7  ;;  %v1466_v51 = vpack.c.bf16 %v484_v6, %v483_v10  ;;  %v385_v47 = vsel %vm160_vm4, %v2659_v34, %v355_v60  ;;  %v165_v50 = vsel %vm160_vm4, %v2643_v33, %v116_v14 }
 0x168   :  { %v363_v22 = vsel %vm129_vm12, %v1812_v38, %v2645_v36  ;;  %v657_v18 = vsel %vm129_vm12, %v1813_v24, %v2645_v36  ;;  %1915 = vrot.lane.b32.xlu0 %v3245_v44, %s2043_s23  ;;  %v2762_v49 = vunpack.i.l.bf16 %v2547_v20  ;;  %v1444_v34 = vpack.c.bf16 %v166_v29, %v165_v50 }
 0x169   :  { %v2733_v9 = vpop.permute.xlu1 %1710  ;;  %v1816_v56 = vpop.permute.xlu0 %1815  ;;  %v386_v31 = vsel %vm160_vm4, %v359_v45, %v363_v22  ;;  %v2741_v59 = vsel %vm160_vm4, %v653_v55, %v657_v18  ;;  %1905 = vrot.lane.b32.xlu1 %v3246_v26, %s2043_s23  ;;  %1441 = vmatpush1.bf16.msra.mxu0 %v3247_v8  ;;  %v3248_v45 = vpack.c.bf16 %v2434_v23, %v2416_v1  ;;  %v2766_v55 = vunpack.i.l.bf16 %v2584_v13 }
 0x16a   :  { %v1818_v37 = vunpack.i.h.bf16 %v1816_v56  ;;  %v2750_v3 = vunpack.i.l.bf16 %v1816_v56  ;;  %1443 = vmatprep.subr.bf16.mxu0 %v1442_v17  ;;  %v1468_v5 = vpack.c.bf16 %v386_v31, %v385_v47  ;;  %v1490_v7 = vpack.c.bf16 %v2741_v59, %v2718_v39 }
 0x16b   :  { %1465 = vmatpush1.bf16.msra.mxu1 %v3248_v45  ;;  %v2044_v28 = vmov 0.0   ;;  %v3249_v33 = vpack.i.bf16 %v2434_v23, %v2416_v1  ;;  %v1703_v1 = vunpack.i.h.bf16 %v2678_v15  ;;  %v1702_v23 = vunpack.i.l.bf16 %v2678_v15 }
 0x16c   :  { %1467 = vmatprep.subr.bf16.mxu1 %v1466_v51  ;;  %980 = vmatprep.mubr.f32.mxu0 %v2044_v28  ;;  %v273_v13 = vsel %vm143_vm13, %v1818_v37, %v2750_v3  ;;  %v269_v24 = vsel %vm136_vm14, %v1673_v2, %v2762_v49  ;;  %v277_v38 = vsel %vm150_vm15, %v1678_v4, %v2766_v55  ;;  %v1708_v30 = vunpack.i.h.bf16 %v2698_v35 }
 0x16d   :  { %1925 = vrot.lane.b32.xlu0 %v3249_v33, %s2043_s23  ;;  %v2773_v27 = vpop.permute.xlu1 %1715  ;;  %v1821_v20 = vpop.permute.xlu0 %1820  ;;  %1057 = vmatprep.mubr.f32.mxu1 %v2044_v28  ;;  %v1707_v61 = vunpack.i.l.bf16 %v2698_v35  ;;  %v289_v2 = vsel %vm160_vm4, %v269_v24, %v273_v13  ;;  %v137_v0 = vsel %vm136_vm14, %v1702_v23, %v2762_v49  ;;  %v465_v32 = vsel %vm136_vm14, %v1703_v1, %v2762_v49 }
 0x16e   :  { %1910 = vrot.lane.b32.xlu1 %v3250_v54, %s2043_s23  ;;  %1445 = vmatpush1.bf16.msra.mxu0 %v1444_v34  ;;  %v1823_v53 = vunpack.i.h.bf16 %v1821_v20  ;;  %v2782_v42 = vunpack.i.l.bf16 %v1821_v20  ;;  %v473_v31 = vsel %vm150_vm15, %v1708_v30, %v2766_v55  ;;  %v1713_v26 = vunpack.i.h.bf16 %v2733_v9 }
 0x16f   :  { %1469 = vmatpush1.bf16.msra.mxu1 %v1468_v5  ;;  %v151_v29 = vsel %vm150_vm15, %v1707_v61, %v2766_v55  ;;  %v1712_v8 = vunpack.i.l.bf16 %v2733_v9 }
 0x170   :  { %v281_v60 = vsel %vm157_vm0, %v1823_v53, %v2782_v42 }
 0x171   :  { %761 = vrot.lane.b32.xlu0 %v2196_v58, %s2041_s21  ;;  %v1761_v15 = vpop.permute.xlu1 %1760  ;;  %v1826_v25 = vpop.permute.xlu0 %1825  ;;  %v290_v6 = vsel %vm160_vm4, %v277_v38, %v281_v60  ;;  %v1717_v60 = vunpack.i.l.bf16 %v2773_v27 }
 0x172   :  { %1920 = vrot.lane.b32.xlu1 %v1919_v62, %s2043_s23  ;;  %v1763_v14 = vunpack.i.h.bf16 %v1761_v15  ;;  %v1762_v22 = vunpack.i.l.bf16 %v1761_v15  ;;  %v1828_v18 = vunpack.i.h.bf16 %v1826_v25  ;;  %v1827_v63 = vunpack.i.l.bf16 %v1826_v25 }
 0x173   :  { %v1446_v35 = vpack.c.bf16 %v290_v6, %v289_v2  ;;  %v1929_v15 = vpack.i.bf16 %v2334_v48, %v2341_v52 }
 0x174   :  { %v519_v17 = vsel %vm60_vm3, %v1762_v22, %v2290_v16  ;;  %v813_v44 = vsel %vm60_vm3, %v1763_v14, %v2290_v16  ;;  %v144_v56 = vsel %vm143_vm13, %v1827_v63, %v2750_v3  ;;  %v469_v10 = vsel %vm143_vm13, %v1828_v18, %v2750_v3 }
 0x175   :  { %769 = vrot.lane.b32.xlu0 %v2196_v58, %s2042_s22  ;;  %1447 = vmatprep.subr.bf16.mxu0 %v1446_v35  ;;  %v1766_v16 = vpop.permute.xlu1 %1765  ;;  %v1831_v37 = vpop.permute.xlu0 %1830  ;;  %v485_v5 = vsel %vm160_vm4, %v465_v32, %v469_v10  ;;  %v2826_v4 = vsel %vm160_vm4, %v2130_v40, %v519_v17  ;;  %v167_v9 = vsel %vm160_vm4, %v137_v0, %v144_v56  ;;  %v3251_v35 = vld [vmem:[#allocation11_spill] sm:$0xff]  ;;  %vm909_vm3 = vcmask 785408  }
 0x176   :  { %757 = vrot.lane.b32.xlu1 %v2180_v57, %s2037_s17  ;;  %v1768_v51 = vunpack.i.h.bf16 %v1766_v16  ;;  %v1767_v47 = vunpack.i.l.bf16 %v1766_v16  ;;  %v1833_v45 = vunpack.i.h.bf16 %v1831_v37  ;;  %v1832_v50 = vunpack.i.l.bf16 %v1831_v37  ;;  %v3254_v16 = vld [vmem:[#allocation12_spill] sm:$0xff] }
 0x177   :  { %v2831_v58 = vsel %vm160_vm4, %v2133_v41, %v813_v44  ;;  %v367_v22 = vsel %vm136_vm14, %v1712_v8, %v2762_v49  ;;  %v375_v18 = vsel %vm150_vm15, %v1717_v60, %v2766_v55  ;;  %v3252_v17 = vpack.i.bf16 %v2460_v46, %v3251_v35  ;;  %v3253_v8 = vld [vmem:[#allocation14_spill] sm:$0xff] }
 0x178   :  { %v527_v34 = vsel %vm74_vm5, %v1767_v47, %v2294_v21  ;;  %v821_v33 = vsel %vm74_vm5, %v1768_v51, %v2294_v21  ;;  %v158_v20 = vsel %vm157_vm0, %v1832_v50, %v2782_v42  ;;  %v477_v13 = vsel %vm157_vm0, %v1833_v45, %v2782_v42  ;;  %v3256_v51 = vld [vmem:[#allocation10_spill] sm:$0xff]  ;;  %v3257_v47 = vld [vmem:[#allocation9_spill] sm:$0xff] }
 0x179   :  { %v1836_v40 = vpop.permute.xlu0 %1835  ;;  %v486_v54 = vsel %vm160_vm4, %v473_v31, %v477_v13  ;;  %v2844_v53 = vsel %vm160_vm4, %v2282_v11, %v527_v34  ;;  %v168_v41 = vsel %vm160_vm4, %v151_v29, %v158_v20  ;;  %v2849_v1 = vsel %vm160_vm4, %v2286_v12, %v821_v33  ;;  %v3259_v50 = vld [vmem:[#allocation17_spill] sm:$0xff]  ;;  %v3262_v34 = vld [vmem:[#allocation15_spill] sm:$0xff] }
 0x17a   :  { %765 = vrot.lane.b32.xlu1 %v2180_v57, %s2039_s19  ;;  %v1838_v21 = vunpack.i.h.bf16 %v1836_v40  ;;  %v1837_v23 = vunpack.i.l.bf16 %v1836_v40  ;;  %v1470_v24 = vpack.c.bf16 %v486_v54, %v485_v5  ;;  %v1934_v38 = vpack.i.bf16 %v2844_v53, %v2826_v4  ;;  %v3260_v5 = vld [vmem:[#allocation16_spill] sm:$0xff]  ;;  %v3263_v33 = vld [vmem:[#allocation13_spill] sm:$0xff] }
 0x17b   :  { %v1484_v11 = vpack.c.bf16 %v2844_v53, %v2826_v4  ;;  %v1448_v62 = vpack.c.bf16 %v168_v41, %v167_v9  ;;  %v1506_v30 = vpack.c.bf16 %v2849_v1, %v2831_v58  ;;  %v661_v12 = vsel %vm136_vm14, %v1713_v26, %v2762_v49  ;;  %v40_v13 = vld [vmem:[%s3208_s2 + $0x8] sm:$0xff]  ;;  %v39_v54 = vld [vmem:[%s3208_s2] sm:$0xff] }
 0x17c   :  { %v1718_v57 = vunpack.i.h.bf16 %v2773_v27  ;;  %v665_v61 = vsel %vm143_vm13, %v1838_v21, %v2750_v3  ;;  %1471 = vmatprep.subr.bf16.mxu1 %v1470_v24  ;;  %1935 = vrot.lane.b32.xlu0 %v1934_v38, %s2043_s23  ;;  %v371_v6 = vsel %vm143_vm13, %v1837_v23, %v2750_v3  ;;  %v1939_v44 = vpack.i.bf16 %v2849_v1, %v2831_v58 }
 0x17d   :  { %1449 = vmatpush1.bf16.msra.mxu0 %v1448_v62  ;;  %v1841_v25 = vpop.permute.xlu0 %1840  ;;  %v2869_v2 = vsel %vm160_vm4, %v661_v12, %v665_v61  ;;  %v387_v56 = vsel %vm160_vm4, %v367_v22, %v371_v6  ;;  %v3255_v37 = vpack.i.bf16 %v3253_v8, %v3254_v16  ;;  %v3258_v45 = vpack.i.bf16 %v3256_v51, %v3257_v47 }
 0x17e   :  { %1930 = vrot.lane.b32.xlu1 %v1929_v15, %s2043_s23  ;;  %v1843_v27 = vunpack.i.h.bf16 %v1841_v25  ;;  %v1842_v14 = vunpack.i.l.bf16 %v1841_v25  ;;  %v669_v63 = vsel %vm150_vm15, %v1718_v57, %v2766_v55  ;;  %v3261_v9 = vpack.i.bf16 %v3259_v50, %v3260_v5 }
 0x17f   :  { %v3264_v20 = vpack.i.bf16 %v3262_v34, %v3263_v33  ;;  %v2045_v40 = vmov 0   ;;  %vm1288_vm5 = vcmask 7168  }
 0x180   :  { %v379_v0 = vsel %vm157_vm0, %v1842_v14, %v2782_v42  ;;  %v673_v32 = vsel %vm157_vm0, %v1843_v27, %v2782_v42  ;;  %1945 = vrot.lane.b32.xlu0 %v3252_v17, %s2043_s23  ;;  %1969 = vset.pattern.permute.xlu1 %v2045_v40 }
 0x181   :  { %v388_v10 = vsel %vm160_vm4, %v375_v18, %v379_v0  ;;  %v2893_v29 = vsel %vm160_vm4, %v669_v63, %v673_v32  ;;  %1970 = vset.pattern.permute.xlu0 %v2045_v40  ;;  %v3265_v63 = vld [vmem:[#allocation18_spill] sm:$0xff] }
 0x182   :  { %1940 = vrot.lane.b32.xlu1 %v1939_v44, %s2043_s23  ;;  %v1472_v31 = vpack.c.bf16 %v388_v10, %v387_v56  ;;  %v1494_v26 = vpack.c.bf16 %v2893_v29, %v2869_v2 }
 0x184   :  { %1473 = vmatpush1.bf16.msra.mxu1 %v1472_v31  ;;  %1955 = vrot.lane.b32.xlu0 %v3255_v37, %s2043_s23 }
 0x186   :  { %1950 = vrot.lane.b32.xlu1 %v3258_v45, %s2043_s23 }
 0x188   :  { %1965 = vrot.lane.b32.xlu0 %v3261_v9, %s2043_s23 }
 0x18a   :  { %1960 = vrot.lane.b32.xlu1 %v3264_v20, %s2043_s23 }
 0x18c   :  { %906 = vperm.xlu0 %1970, %v40_v13  }
 0x18d   :  { %v1771_v41 = vpop.permute.xlu1 %1770 }
 0x18e   :  { %901 = vperm.xlu1 %1969, %v39_v54  }
 0x191   :  { %v1851_v21 = vpop.permute.xlu1 %1850 }
 0x192   :  { %v1853_v12 = vunpack.i.h.bf16 %v1851_v21  ;;  %v1852_v57 = vunpack.i.l.bf16 %v1851_v21 }
 0x194   :  { %v841_v0 = vsel %vm108_vm9, %v1853_v12, %v3265_v63  ;;  %v547_v32 = vsel %vm108_vm9, %v1852_v57, %v3265_v63 }
 0x195   :  { %v1861_v24 = vpop.permute.xlu1 %1860 }
 0x196   :  { %v1863_v61 = vunpack.i.h.bf16 %v1861_v24  ;;  %v1862_v15 = vunpack.i.l.bf16 %v1861_v24 }
 0x198   :  { %v849_v17 = vsel %vm122_vm10, %v1863_v61, %v2617_v19  ;;  %v555_v44 = vsel %vm122_vm10, %v1862_v15, %v2617_v19 }
 0x199   :  { %v742_v25 = vpop.permute.xlu1 %741 }
 0x19d   :  { %v2920_v23 = vpop.permute.xlu0 %1845  ;;  %v750_v54 = vpop.permute.xlu1 %749 }
 0x1a1   :  { %v1856_v38 = vpop.permute.xlu0 %1855 }
 0x1a2   :  { %v1858_v60 = vunpack.i.h.bf16 %v1856_v38  ;;  %v1857_v62 = vunpack.i.l.bf16 %v1856_v38  ;;  %v743_v38 = vsel %vm108_vm9, %v742_v25, %v3265_v63  ;;  %v2982_v63 = vpop.permute.xlu1 %1870  ;;  %vm1303_vm9 = vcmask 48128  }
 0x1a4   :  { %v845_v27 = vsel %vm115_vm11, %v1858_v60, %v2637_v43  ;;  %v551_v14 = vsel %vm115_vm11, %v1857_v62, %v2637_v43  ;;  %v751_v60 = vsel %vm122_vm10, %v750_v54, %v2617_v19  ;;  %v2976_v19 = vunpack.i.l.bf16 %v1771_v41 }
 0x1a5   :  { %v1866_v6 = vpop.permute.xlu0 %1865  ;;  %v2939_v37 = vsel %vm160_vm4, %v547_v32, %v551_v14  ;;  %v2945_v9 = vsel %vm160_vm4, %v841_v0, %v845_v27  ;;  %vm1306_vm10 = vcmask 56320  }
 0x1a6   :  { %v1868_v22 = vunpack.i.h.bf16 %v1866_v6  ;;  %v1867_v18 = vunpack.i.l.bf16 %v1866_v6  ;;  %v2974_v6 = vunpack.i.h.bf16 %v1771_v41  ;;  %v2984_v0 = vpop.permute.xlu1 %1880 }
 0x1a8   :  { %v853_v56 = vsel %vm129_vm12, %v1868_v22, %v2645_v36  ;;  %v559_v10 = vsel %vm129_vm12, %v1867_v18, %v2645_v36 }
 0x1a9   :  { %v746_v31 = vpop.permute.xlu0 %745  ;;  %v2942_v45 = vsel %vm160_vm4, %v555_v44, %v559_v10  ;;  %v2948_v20 = vsel %vm160_vm4, %v849_v17, %v853_v56 }
 0x1aa   :  { %v1492_v13 = vpack.c.bf16 %v2942_v45, %v2939_v37  ;;  %v1514_v40 = vpack.c.bf16 %v2948_v20, %v2945_v9  ;;  %v747_v21 = vsel %vm115_vm11, %v746_v31, %v2637_v43  ;;  %vm1318_vm11 = vcmask 130048  }
 0x1ab   :  { %v2963_v12 = vsel %vm160_vm4, %v743_v38, %v747_v21 }
 0x1ad   :  { %v754_v24 = vpop.permute.xlu0 %753 }
 0x1ae   :  { %v755_v62 = vsel %vm129_vm12, %v754_v24, %v2645_v36  ;;  %vm1398_vm12 = vcmask 57344  }
 0x1af   :  { %v2966_v57 = vsel %vm160_vm4, %v751_v60, %v755_v62 }
 0x1b0   :  { %v1516_v61 = vpack.c.bf16 %v2966_v57, %v2963_v12 }
 0x1b1   :  { %v2970_v43 = vpop.permute.xlu0 %1875 }
 0x1b5   :  { %v2972_v15 = vpop.permute.xlu0 %1885 }
 0x1b9   :  { %v1891_v25 = vpop.permute.xlu0 %1890 }
 0x1ba   :  { %v1893_v36 = vunpack.i.h.bf16 %v1891_v25  ;;  %v1892_v27 = vunpack.i.l.bf16 %v1891_v25 }
 0x1bc   :  { %v303_v14 = vsel %vm204_vm2, %v1892_v27, %v2976_v19  ;;  %v304_v22 = vsel %vm204_vm2, %v1893_v36, %v2974_v6 }
 0x1bd   :  { %v1450_v18 = vpack.c.bf16 %v304_v22, %v303_v14 }
 0x1bf   :  { %1451 = vmatprep.subr.bf16.mxu0 %v1450_v18 }
 0x1d6   :  { %v1901_v32 = vpop.permute.xlu0 %1900 }
 0x1d7   :  { %v1903_v17 = vunpack.i.h.bf16 %v1901_v32  ;;  %v1902_v44 = vunpack.i.l.bf16 %v1901_v32  ;;  %v1896_v56 = vpop.permute.xlu1 %1895 }
 0x1d8   :  { %v1898_v41 = vunpack.i.h.bf16 %v1896_v56  ;;  %v1897_v10 = vunpack.i.l.bf16 %v1896_v56  ;;  %v3002_v56 = vunpack.i.l.bf16 %v2920_v23 }
 0x1d9   :  { %v499_v31 = vsel %vm204_vm2, %v1902_v44, %v2976_v19  ;;  %v500_v54 = vsel %vm204_vm2, %v1903_v17, %v2974_v6  ;;  %v2999_v44 = vunpack.i.h.bf16 %v2920_v23 }
 0x1da   :  { %v1916_v21 = vpop.permute.xlu0 %1915  ;;  %v205_v24 = vsel %vm204_vm2, %v1897_v10, %v2976_v19  ;;  %v206_v38 = vsel %vm204_vm2, %v1898_v41, %v2974_v6  ;;  %v1474_v60 = vpack.c.bf16 %v500_v54, %v499_v31 }
 0x1db   :  { %v1906_v62 = vpop.permute.xlu1 %1905  ;;  %v1452_v25 = vpack.c.bf16 %v206_v38, %v205_v24  ;;  %v1918_v14 = vunpack.i.h.bf16 %v1916_v21  ;;  %v1917_v22 = vunpack.i.l.bf16 %v1916_v21 }
 0x1dc   :  { %v1908_v36 = vunpack.i.h.bf16 %v1906_v62  ;;  %v1907_v27 = vunpack.i.l.bf16 %v1906_v62  ;;  %1475 = vmatprep.subr.bf16.mxu1 %v1474_v60 }
 0x1dd   :  { %1453 = vmatpush1.bf16.msra.mxu0 %v1452_v25  ;;  %v207_v38 = vsel %vm204_vm2, %v1917_v22, %v3002_v56  ;;  %v208_v60 = vsel %vm204_vm2, %v1918_v14, %v2999_v44 }
 0x1de   :  { %v401_v32 = vsel %vm204_vm2, %v1907_v27, %v2976_v19  ;;  %v402_v17 = vsel %vm204_vm2, %v1908_v36, %v2974_v6 }
 0x1df   :  { %v1926_v18 = vpop.permute.xlu0 %1925  ;;  %v1476_v10 = vpack.c.bf16 %v402_v17, %v401_v32 }
 0x1e0   :  { %v1911_v41 = vpop.permute.xlu1 %1910  ;;  %v1928_v24 = vunpack.i.h.bf16 %v1926_v18  ;;  %v1927_v21 = vunpack.i.l.bf16 %v1926_v18  ;;  %v1456_v18 = vpack.c.bf16 %v208_v60, %v207_v38  ;;  %v1878_v60 = vunpack.i.h.bf16 %v2970_v43 }
 0x1e1   :  { %v1913_v31 = vunpack.i.h.bf16 %v1911_v41  ;;  %v1912_v54 = vunpack.i.l.bf16 %v1911_v41  ;;  %1477 = vmatpush1.bf16.msra.mxu1 %v1476_v10  ;;  %v3021_v41 = vld [vmem:[%s3207_s1] sm:$0xff] }
 0x1e2   :  { %v403_v22 = vsel %vm204_vm2, %v1927_v21, %v3002_v56  ;;  %v404_v14 = vsel %vm204_vm2, %v1928_v24, %v2999_v44  ;;  %v3266_v21 = vpack.c.bf16 %v2334_v48, %v2341_v52  ;;  %v1872_v48 = vunpack.i.l.bf16 %v2982_v63 }
 0x1e3   :  { %v305_v62 = vsel %vm204_vm2, %v1912_v54, %v3002_v56  ;;  %v306_v23 = vsel %vm204_vm2, %v1913_v31, %v2999_v44  ;;  %v3012_v25 = vpop.permute.xlu0 %761  ;;  %v1887_v54 = vunpack.i.l.bf16 %v2972_v15  ;;  %v1883_v52 = vunpack.i.h.bf16 %v2984_v0 }
 0x1e4   :  { %v1921_v36 = vpop.permute.xlu1 %1920  ;;  %v1454_v27 = vpack.c.bf16 %v306_v23, %v305_v62  ;;  %v1877_v62 = vunpack.i.l.bf16 %v2970_v43  ;;  %v1480_v23 = vpack.c.bf16 %v404_v14, %v403_v22  ;;  %v3046_v43 = vld [vmem:[%s3207_s1 + $0x8] sm:$0xff]  ;;  %v3267_v22 = vpack.c.bf16 %v3256_v51, %v3257_v47 }
 0x1e5   :  { %v1923_v32 = vunpack.i.h.bf16 %v1921_v36  ;;  %v1922_v17 = vunpack.i.l.bf16 %v1921_v36  ;;  %v1873_v36 = vunpack.i.h.bf16 %v2982_v63  ;;  %v861_v4 = vsel %vm143_vm13, %v1878_v60, %v2750_v3 }
 0x1e6   :  { %1455 = vmatprep.subr.bf16.mxu0 %v1454_v27  ;;  %v1882_v27 = vunpack.i.l.bf16 %v2984_v0  ;;  %v567_v53 = vsel %vm143_vm13, %v1877_v62, %v2750_v3  ;;  %v563_v1 = vsel %vm136_vm14, %v1872_v48, %v2762_v49  ;;  %v3268_v47 = vpack.c.bf16 %v3253_v8, %v3254_v16 }
 0x1e7   :  { %1457 = vmatpush1.bf16.msra.mxu0 %v1456_v18  ;;  %v501_v10 = vsel %vm204_vm2, %v1922_v17, %v3002_v56  ;;  %v502_v31 = vsel %vm204_vm2, %v1923_v32, %v2999_v44  ;;  %v1888_v17 = vunpack.i.h.bf16 %v2972_v15  ;;  %v770_v32 = vpop.permute.xlu0 %769  ;;  %v575_v15 = vsel %vm157_vm0, %v1887_v54, %v2782_v42 }
 0x1e8   :  { %v758_v38 = vpop.permute.xlu1 %757  ;;  %1483 = vmatprep.subr.bf16.mxu0 %v3266_v21  ;;  %v1478_v24 = vpack.c.bf16 %v502_v31, %v501_v10  ;;  %v571_v63 = vsel %vm150_vm15, %v1882_v27, %v2766_v55  ;;  %v3269_v0 = vpack.c.bf16 %v2460_v46, %v3251_v35  ;;  %v3270_v21 = vpack.c.bf16 %v3262_v34, %v3263_v33 }
 0x1e9   :  { %v869_v51 = vsel %vm157_vm0, %v1888_v17, %v2782_v42  ;;  %v584_v14 = vsel %vm160_vm4, %v571_v63, %v575_v15  ;;  %v583_v8 = vsel %vm160_vm4, %v563_v1, %v567_v53  ;;  %v763_v39 = vsel %vm143_vm13, %v3012_v25, %v2750_v3 }
 0x1ea   :  { %1415 = vmatmul.mubr.msk.f32.vlgmr.msra.gmra.mrb[0].mxu0 %vm909_vm3, %v3021_v41  ;;  %1479 = vmatprep.subr.bf16.mxu1 %v1478_v24  ;;  %v771_v59 = vsel %vm157_vm0, %v770_v32, %v2782_v42  ;;  %v1496_v34 = vpack.c.bf16 %v584_v14, %v583_v8  ;;  %v3271_v33 = vpack.c.bf16 %v3259_v50, %v3260_v5 }
 0x1eb   :  { %1481 = vmatpush1.bf16.msra.mxu1 %v1480_v23  ;;  %1485 = vmatpush1.bf16.msra.mxu0 %v1484_v11  ;;  %v857_v11 = vsel %vm136_vm14, %v1873_v36, %v2762_v49 }
 0x1ec   :  { %v766_v18 = vpop.permute.xlu1 %765  ;;  %1487 = vmatprep.subr.bf16.mxu0 %v3267_v22  ;;  %1507 = vmatprep.subr.bf16.mxu1 %v1506_v30  ;;  %v865_v30 = vsel %vm150_vm15, %v1883_v52, %v2766_v55  ;;  %v877_v16 = vsel %vm160_vm4, %v857_v11, %v861_v4 }
 0x1ed   :  { %986 = vmatprep.mubr.f32.mxu0 %v2044_v28  ;;  %v767_v46 = vsel %vm150_vm15, %v766_v18, %v2766_v55  ;;  %v878_v60 = vsel %vm160_vm4, %v865_v30, %v869_v51 }
 0x1ee   :  { %1416 = vmatmul.mubr.msk.f32.gmra.mrb[2].mxu0 %vm909_vm3, %v3046_v43  ;;  %1417 = vmatmul.mubr.msk.f32.vlgmr.msra.gmra.mrb[0].mxu1 %vm909_vm3, %v3021_v41  ;;  %v1936_v58 = vpop.permute.xlu0 %1935  ;;  %v1518_v29 = vpack.c.bf16 %v878_v60, %v877_v16 }
 0x1ef   :  { %1489 = vmatpush1.bf16.msra.mxu0 %v3268_v47  ;;  %1509 = vmatpush1.bf16.msra.mxu1 %v3269_v0  ;;  %v1938_v10 = vunpack.i.h.bf16 %v1936_v58  ;;  %v1937_v31 = vunpack.i.l.bf16 %v1936_v58 }
 0x1f0   :  { %v1931_v54 = vpop.permute.xlu1 %1930  ;;  %1491 = vmatprep.subr.bf16.mxu0 %v1490_v7  ;;  %1511 = vmatprep.subr.bf16.mxu1 %v3270_v21  ;;  %v759_v7 = vsel %vm136_vm14, %v758_v38, %v2762_v49  ;;  %v780_v38 = vsel %vm160_vm4, %v767_v46, %v771_v59 }
 0x1f1   :  { %v1933_v35 = vunpack.i.h.bf16 %v1931_v54  ;;  %v1932_v24 = vunpack.i.l.bf16 %v1931_v54  ;;  %1063 = vmatprep.mubr.f32.mxu1 %v2044_v28  ;;  %1134 = vmatprep.mubr.f32.mxu0 %v2044_v28  ;;  %v598_v62 = vsel %vm204_vm2, %v1938_v10, %v2974_v6  ;;  %v597_v37 = vsel %vm204_vm2, %v1937_v31, %v2976_v19 }
 0x1f2   :  { %1418 = vmatmul.mubr.msk.f32.gmra.mrb[2].mxu1 %vm909_vm3, %v3046_v43  ;;  %v1946_v55 = vpop.permute.xlu0 %1945  ;;  %v779_v36 = vsel %vm160_vm4, %v759_v7, %v763_v39  ;;  %v1500_v48 = vpack.c.bf16 %v598_v62, %v597_v37  ;;  %vm2047_vm4 = vmmov 0  }
 0x1f3   :  { %1493 = vmatpush1.bf16.msra.mxu0 %v1492_v13  ;;  %1513 = vmatpush1.bf16.msra.mxu1 %v3271_v33  ;;  %v1948_v3 = vunpack.i.h.bf16 %v1946_v55  ;;  %v1947_v25 = vunpack.i.l.bf16 %v1946_v55  ;;  %v695_v42 = vsel %vm204_vm2, %v1932_v24, %v2976_v19  ;;  %v696_v49 = vsel %vm204_vm2, %v1933_v35, %v2974_v6 }
 0x1f4   :  { %v1941_v45 = vpop.permute.xlu1 %1940  ;;  %1495 = vmatprep.subr.bf16.mxu0 %v1494_v26  ;;  %1515 = vmatprep.subr.bf16.mxu1 %v1514_v40  ;;  %v1498_v2 = vpack.c.bf16 %v696_v49, %v695_v42  ;;  %v1520_v32 = vpack.c.bf16 %v780_v38, %v779_v36 }
 0x1f5   :  { %v794_v50 = vsel %vm204_vm2, %v1948_v3, %v2974_v6  ;;  %v793_v5 = vsel %vm204_vm2, %v1947_v25, %v2976_v19  ;;  %v1943_v13 = vunpack.i.h.bf16 %v1941_v45  ;;  %v1942_v23 = vunpack.i.l.bf16 %v1941_v45  ;;  %1211 = vmatprep.mubr.f32.mxu1 %v2044_v28 }
 0x1f6   :  { %v1524_v27 = vpack.c.bf16 %v794_v50, %v793_v5  ;;  %v1956_v17 = vpop.permute.xlu0 %1955 }
 0x1f7   :  { %1497 = vmatpush1.bf16.msra.mxu0 %v1496_v34  ;;  %1517 = vmatpush1.bf16.msra.mxu1 %v1516_v61  ;;  %v1958_v26 = vunpack.i.h.bf16 %v1956_v17  ;;  %v1957_v9 = vunpack.i.l.bf16 %v1956_v17  ;;  %v891_v20 = vsel %vm204_vm2, %v1942_v23, %v2976_v19  ;;  %v892_v40 = vsel %vm204_vm2, %v1943_v13, %v2974_v6 }
 0x1f8   :  { %v1951_v52 = vpop.permute.xlu1 %1950  ;;  %1499 = vmatprep.subr.bf16.mxu0 %v1498_v2  ;;  %1519 = vmatprep.subr.bf16.mxu1 %v1518_v29  ;;  %v1522_v4 = vpack.c.bf16 %v892_v40, %v891_v20 }
 0x1f9   :  { %v600_v15 = vsel %vm204_vm2, %v1958_v26, %v2999_v44  ;;  %v599_v12 = vsel %vm204_vm2, %v1957_v9, %v3002_v56  ;;  %v1953_v57 = vunpack.i.h.bf16 %v1951_v52  ;;  %v1952_v61 = vunpack.i.l.bf16 %v1951_v52 }
 0x1fa   :  { %v1504_v18 = vpack.c.bf16 %v600_v15, %v599_v12  ;;  %v1966_v22 = vpop.permute.xlu0 %1965 }
 0x1fb   :  { %1501 = vmatpush1.bf16.msra.mxu0 %v1500_v48  ;;  %1521 = vmatpush1.bf16.msra.mxu1 %v1520_v32  ;;  %v1968_v19 = vunpack.i.h.bf16 %v1966_v22  ;;  %v1967_v6 = vunpack.i.l.bf16 %v1966_v22  ;;  %v697_v53 = vsel %vm204_vm2, %v1952_v61, %v3002_v56  ;;  %v698_v11 = vsel %vm204_vm2, %v1953_v57, %v2999_v44 }
 0x1fc   :  { %v1961_v63 = vpop.permute.xlu1 %1960  ;;  %1523 = vmatprep.subr.bf16.mxu1 %v1522_v4  ;;  %v1502_v51 = vpack.c.bf16 %v698_v11, %v697_v53 }
 0x1fd   :  { %v796_v58 = vsel %vm204_vm2, %v1968_v19, %v2999_v44  ;;  %v795_v1 = vsel %vm204_vm2, %v1967_v6, %v3002_v56  ;;  %v1963_v30 = vunpack.i.h.bf16 %v1961_v63  ;;  %v1962_v47 = vunpack.i.l.bf16 %v1961_v63 }
 0x1fe   :  { %1503 = vmatprep.subr.bf16.mxu0 %v1502_v51  ;;  %v1528_v0 = vpack.c.bf16 %v796_v58, %v795_v1 }
 0x1ff   :  { %1505 = vmatpush1.bf16.msra.mxu0 %v1504_v18  ;;  %1525 = vmatpush1.bf16.msra.mxu1 %v1524_v27  ;;  %v893_v14 = vsel %vm204_vm2, %v1962_v47, %v3002_v56  ;;  %v894_v10 = vsel %vm204_vm2, %v1963_v30, %v2999_v44 }
 0x200   :  { %v1526_v31 = vpack.c.bf16 %v894_v10, %v893_v14 }
 0x202   :  { %1419 = vmatmul.mubr.msk.f32.vlgmr.msra.gmra.mrb[4].mxu0 %vm909_vm3, %v3021_v41  ;;  %1527 = vmatprep.subr.bf16.mxu1 %v1526_v31 }
 0x203   :  { %1529 = vmatpush1.bf16.msra.mxu1 %v1528_v0  ;;  %1140 = vmatprep.mubr.f32.mxu0 %v2044_v28 }
 0x206   :  { %1420 = vmatmul.mubr.msk.f32.gmra.mrb[6].mxu0 %vm909_vm3, %v3046_v43  ;;  %1421 = vmatmul.mubr.msk.f32.vlgmr.msra.gmra.mrb[4].mxu1 %vm909_vm3, %v3021_v41 }
 0x207   :  { %1217 = vmatprep.mubr.f32.mxu1 %v2044_v28  ;;  %1431 = vmatprep.mubr.msk.f32.mxu0 %vm2047_vm4, %v2044_v28 }
 0x20a   :  { %1422 = vmatmul.mubr.msk.f32.gmra.mrb[6].mxu1 %vm909_vm3, %v3046_v43 }
 0x20b   :  { %v3164_v8 = vpop.permute.xlu0 %906 }
 0x20d   :  { %v902_v44 = vpop.permute.xlu1 %901 }
 0x2bd   :  { %v982_v56 = vpop.f32.mrb[0].mxu0 }
 0x2be   :  { %v983_v54 = vadd.f32 %v982_v56, %v902_v44  ;;  %v984_v21 = vpop.f32.mrb[1].mxu0 }
 0x2bf   :  { %v985_v46 = vadd.f32 %v984_v21, %v902_v44  ;;  %v42_v21 = vld [vmem:[#allocation2] sm:$0x1] }
 0x2c0   :  { %v1224_v16 = vmax.f32 %v983_v54, 0.0 }
 0x2c1   :  { %v988_v35 = vpop.f32.mrb[2].mxu0  ;;  %v1059_v24 = vpop.f32.mrb[0].mxu1  ;;  %v1225_v33 = vmax.f32 %v985_v46, 0.0 }
 0x2c2   :  { %v989_v60 = vadd.f32 %v988_v35, %v3164_v8  ;;  %v1060_v39 = vadd.f32 %v1059_v24, %v902_v44  ;;  %v1061_v59 = vpop.f32.mrb[1].mxu1  ;;  %v1240_v41 = vsel %vm50_vm1, %v1224_v16, -inf  ;;  %v990_v7 = vpop.f32.mrb[3].mxu0  ;;  %v2046_v16 = vmov 0.0|0.0  }
 0x2c3   :  { %1241 = vmax.xlane.f32.xlu1 %v1240_v41  ;;  %v991_v34 = vadd.f32 %v990_v7, %v3164_v8  ;;  %v1062_v25 = vadd.f32 %v1061_v59, %v902_v44  ;;  %v1246_v23 = vsel %vm50_vm1, %v1225_v33, -inf  ;;  %1530 = vmatprep.subr.bf16.mxu0 %v2046_v16 }
 0x2c4   :  { %v1232_v55 = vmax.f32 %v989_v60, 0.0  ;;  %v1226_v43 = vmax.f32 %v1060_v39, 0.0 }
 0x2c5   :  { %v1065_v3 = vpop.f32.mrb[2].mxu1  ;;  %v1233_v45 = vmax.f32 %v991_v34, 0.0  ;;  %v1227_v50 = vmax.f32 %v1062_v25, 0.0 }
 0x2c6   :  { %v1066_v42 = vadd.f32 %v1065_v3, %v3164_v8  ;;  %v1243_v49 = vsel %vm50_vm1, %v1232_v55, -inf  ;;  %v1252_v38 = vsel %vm50_vm1, %v1226_v43, -inf  ;;  %v1067_v62 = vpop.f32.mrb[3].mxu1 }
 0x2c7   :  { %1244 = vmax.xlane.f32.xlu0 %v1243_v49  ;;  %1253 = vmax.xlane.f32.xlu1 %v1252_v38  ;;  %v1068_v5 = vadd.f32 %v1067_v62, %v3164_v8  ;;  %v1249_v36 = vsel %vm50_vm1, %v1233_v45, -inf  ;;  %v1258_v17 = vsel %vm50_vm1, %v1227_v50, -inf }
 0x2c8   :  { %v1234_v37 = vmax.f32 %v1066_v42, 0.0 }
 0x2c9   :  { %v1235_v27 = vmax.f32 %v1068_v5, 0.0 }
 0x2ca   :  { %v1255_v13 = vsel %vm50_vm1, %v1234_v37, -inf }
 0x2cb   :  { %1256 = vmax.xlane.f32.xlu0 %v1255_v13  ;;  %1247 = vmax.xlane.f32.xlu1 %v1246_v23  ;;  %v1261_v2 = vsel %vm50_vm1, %v1235_v27, -inf }
 0x2cf   :  { %1250 = vmax.xlane.f32.xlu0 %v1249_v36  ;;  %1259 = vmax.xlane.f32.xlu1 %v1258_v17 }
 0x2d3   :  { %1262 = vmax.xlane.f32.xlu0 %v1261_v2 }
 0x2d5   :  { %v1136_v29 = vpop.f32.mrb[4].mxu0 }
 0x2d6   :  { %v1137_v26 = vadd.f32 %v1136_v29, %v902_v44  ;;  %v1138_v9 = vpop.f32.mrb[5].mxu0 }
 0x2d7   :  { %v1139_v40 = vadd.f32 %v1138_v9, %v902_v44  ;;  %v1314_v9 = vlaneseq }
 0x2d8   :  { %v1228_v20 = vmax.f32 %v1137_v26, 0.0  ;;  %v41_v26 = vld [vmem:[%s3209_s3] sm:$0x1]  ;;  %s1997_s3 = scalar_lea.vmem %s1407_s7, 16 }
 0x2d9   :  { %v1142_v32 = vpop.f32.mrb[6].mxu0  ;;  %v1213_v48 = vpop.f32.mrb[4].mxu1  ;;  %v1229_v4 = vmax.f32 %v1139_v40, 0.0  ;;  %p1998_p8 = scmp.ne.s32.totalorder %s1407_s7, %s1997_s3  ;;  %p2003_p10 = scmp.lt.s32.totalorder %s2001_s8, %s1997_s3 }
 0x2da   :  { %v1143_v52 = vadd.f32 %v1142_v32, %v3164_v8  ;;  %v1214_v15 = vadd.f32 %v1213_v48, %v902_v44  ;;  %v1144_v12 = vpop.f32.mrb[7].mxu0  ;;  %v1215_v57 = vpop.f32.mrb[5].mxu1  ;;  %v1264_v61 = vsel %vm50_vm1, %v1228_v20, -inf  ;;  %v1315_v20 = vshrl.u32 %v1314_v9, 7 }
 0x2db   :  { %1265 = vmax.xlane.f32.xlu1 %v1264_v61  ;;  %v1145_v19 = vadd.f32 %v1144_v12, %v3164_v8  ;;  %v1216_v53 = vadd.f32 %v1215_v57, %v902_v44  ;;  %v1270_v30 = vsel %vm50_vm1, %v1229_v4, -inf  ;;  %p2004_p11 = por %p2003_p10, %p2002_p9 }
 0x2dc   :  { %v1236_v18 = vmax.f32 %v1143_v52, 0.0  ;;  %v1230_v22 = vmax.f32 %v1214_v15, 0.0  ;;  %v1316_v40 = vsub.s32 0, %v1315_v20 }
 0x2dd   :  { %v1219_v6 = vpop.f32.mrb[6].mxu1  ;;  %v1237_v47 = vmax.f32 %v1145_v19, 0.0  ;;  %v1231_v0 = vmax.f32 %v1216_v53, 0.0  ;;  %p2005_p12 = pnand %p2004_p11, %p1998_p8 }
 0x2de   :  { %v1220_v11 = vadd.f32 %v1219_v6, %v3164_v8  ;;  %v1221_v63 = vpop.f32.mrb[7].mxu1  ;;  %v1267_v51 = vsel %vm50_vm1, %v1236_v18, -inf  ;;  %v1276_v58 = vsel %vm50_vm1, %v1230_v22, -inf }
 0x2df   :  { %1268 = vmax.xlane.f32.xlu0 %v1267_v51  ;;  %1277 = vmax.xlane.f32.xlu1 %v1276_v58  ;;  %v1222_v14 = vadd.f32 %v1221_v63, %v3164_v8  ;;  %v1273_v44 = vsel %vm50_vm1, %v1237_v47, -inf  ;;  %v1282_v56 = vsel %vm50_vm1, %v1231_v0, -inf }
 0x2e0   :  { %v1238_v1 = vmax.f32 %v1220_v11, 0.0 }
 0x2e1   :  { %v1239_v31 = vmax.f32 %v1222_v14, 0.0 }
 0x2e2   :  { %v1279_v10 = vsel %vm50_vm1, %v1238_v1, -inf }
 0x2e3   :  { %1280 = vmax.xlane.f32.xlu0 %v1279_v10  ;;  %1271 = vmax.xlane.f32.xlu1 %v1270_v30  ;;  %v1285_v54 = vsel %vm50_vm1, %v1239_v31, -inf  ;;  %vm1291_vm1 = vcmask 15360  }
 0x2e7   :  { %1274 = vmax.xlane.f32.xlu0 %v1273_v44  ;;  %1283 = vmax.xlane.f32.xlu1 %v1282_v56 }
 0x2eb   :  { %1286 = vmax.xlane.f32.xlu0 %v1285_v54 }
 0x2f8   :  { %1311 = vperm.xlu1 %1969, %v42_v21  }
 0x350   :  { %v1242_v8 = vpop.xlane.xlu1 %1241 }
 0x354   :  { %v1245_v46 = vpop.xlane.xlu0 %1244  ;;  %v1254_v35 = vpop.xlane.xlu1 %1253 }
 0x358   :  { %v1257_v24 = vpop.xlane.xlu0 %1256  ;;  %v1248_v60 = vpop.xlane.xlu1 %1247 }
 0x359   :  { %v1289_v34 = vsel %vm1288_vm5, %v1242_v8, %v1248_v60 }
 0x35a   :  { %v1292_v28 = vsel %vm1291_vm1, %v1289_v34, %v1254_v35 }
 0x35c   :  { %v1251_v39 = vpop.xlane.xlu0 %1250  ;;  %v1260_v59 = vpop.xlane.xlu1 %1259 }
 0x35d   :  { %v1290_v33 = vsel %vm1288_vm5, %v1245_v46, %v1251_v39  ;;  %v1295_v49 = vsel %vm1294_vm6, %v1292_v28, %v1260_v59 }
 0x35e   :  { %v1293_v42 = vsel %vm1291_vm1, %v1290_v33, %v1257_v24 }
 0x360   :  { %v1263_v41 = vpop.xlane.xlu0 %1262 }
 0x361   :  { %v1296_v38 = vsel %vm1294_vm6, %v1293_v42, %v1263_v41 }
 0x368   :  { %v1266_v7 = vpop.xlane.xlu1 %1265 }
 0x369   :  { %v1298_v62 = vsel %vm1297_vm7, %v1295_v49, %v1266_v7 }
 0x36c   :  { %v1269_v55 = vpop.xlane.xlu0 %1268  ;;  %v1278_v43 = vpop.xlane.xlu1 %1277 }
 0x36d   :  { %v1299_v37 = vsel %vm1297_vm7, %v1296_v38, %v1269_v55 }
 0x370   :  { %v1281_v3 = vpop.xlane.xlu0 %1280  ;;  %v1272_v25 = vpop.xlane.xlu1 %1271 }
 0x371   :  { %v1301_v50 = vsel %vm1300_vm8, %v1298_v62, %v1272_v25 }
 0x372   :  { %v1304_v23 = vsel %vm1303_vm9, %v1301_v50, %v1278_v43 }
 0x374   :  { %v1275_v45 = vpop.xlane.xlu0 %1274  ;;  %v1284_v13 = vpop.xlane.xlu1 %1283 }
 0x375   :  { %v1302_v5 = vsel %vm1300_vm8, %v1299_v37, %v1275_v45  ;;  %v1307_v17 = vsel %vm1306_vm10, %v1304_v23, %v1284_v13 }
 0x376   :  { %v1305_v36 = vsel %vm1303_vm9, %v1302_v5, %v1281_v3 }
 0x378   :  { %v1287_v27 = vpop.xlane.xlu0 %1286  ;;  %v1312_v32 = vpop.permute.xlu1 %1311 }
 0x379   :  { %v1308_v2 = vsel %vm1306_vm10, %v1305_v36, %v1287_v27  ;;  %v1317_v48 = vrot.slane %v1312_v32, %v1316_v40 }
 0x37a   :  { %v1531_v29 = vpack.c.bf16 %v1308_v2, %v1307_v17 }
 0x37c   :  { %1532 = vmatpush3.bf16.msra.mxu0 %v1531_v29 }
 0x37f   :  { %1432 = vmatmul.mubr.msk.f32.vlgmr.msra.gmra.mrb[8].mxu0 %vm1318_vm11, %v41_v26 }
 0x452   :  { %v1388_v52 = vpop.f32.mrb[8].mxu0 }
 0x453   :  { %v1389_v15 = vadd.f32 %v1388_v52, %v1317_v48  ;;  %v1433_v12 = vpop.f32.mrb[9].mxu0 }
 0x455   :  { %v1392_v57 = vsub.f32 0.0, %v1389_v15 }
 0x457   :  { %v1393_v61 = vmul.f32 1.442695, %v1392_v57 }
 0x459   :  { %1971 = vpow2.f32 %v1393_v61 }
 0x463   :  { %v1972_v18 = vpop.eup %1971 }
 0x464   :  { %v1395_v22 = vadd.f32 1.0, %v1972_v18 }
 0x466   :  { %1973 = vrcp.f32 %v1395_v22 }
 0x470   :  { %v1974_v4 = vpop.eup %1973 }
 0x471   :  { %1399 = vst.msk [vmem:[#allocation6] sm:$0x1] %vm1398_vm12, %v1974_v4 }
 0x472   :  { %2008 = shalt.err (!%p2005_p12)
}
 0x473   :  { %s2009_s10 = scalar_lea.hbm %s3211_s5, 16 }
 0x474   :  { %p2010_p13 = scmp.ne.s32.totalorder %s3211_s5, %s2009_s10  ;;  %p2013_p0 = scmp.lt.u32.totalorder %s2009_s10, %s3211_s5 }
 0x476   :  { %p2015_p1 = pnand %p2013_p0, %p2010_p13 }
 0x478   :  { %2018 = shalt.err (!%p2015_p1)
}
 0x479   :  { %1409 = dma.vmem_to_hbm [thread:$0]  %s1407_s7, 16, %s3211_s5, [#allocation5]  }
 0x47a   :  { %2021 = dma.done.wait [#allocation5], 16  }
 0x47b   :  { %2022 = vsyncadd [#allocation5], 4294967280 }
 0x47c   :  { %1413 = vsyncpa [#allocation4], 1 }
 0x47d   :  { %1414 = vsyncpa [#allocation5], 1 }

</bundles_post_ra>
